<compile_context>
chip_gen: v7x
topology: tpu7x:2x2x1
jax: 0.10.0
libtpu: 0.0.40
codegen_flags: <defaults>
</compile_context>

<pallas_src>
import functools

import jax
import jax.numpy as jnp
from jax.experimental import pallas as pl
from jax.experimental.pallas import tpu as pltpu

# ---- small synthetic RoBERTa config (shapes implied by the module) ----
B, S, H = 2, 8, 32          # batch, sequence, hidden (logical)
NH, DH = 2, 16              # heads, head dim (NH*DH == H)
FFN = 64                    # intermediate size (logical)
VOCAB = 50
MAX_POS = 16
NUM_CLASSES = 3             # RM_NUM_CLASSES stand-in
NUM_LAYERS = 2
EPS = 1e-5

BS = B * S                  # rows per block (batch folded into the block)

# lane-dense padded dims (multiples of 128 -> unmasked vector stores)
HP = 128                    # padded hidden
FP = 128                    # padded FFN
CP = 128                    # padded classifier width
HSLOT = 128                 # one 128-lane slot per head
QKVW = 3 * NH * HSLOT       # fused QKV width, head-slot aligned

_LAYER_ORDER = ('wqkv', 'bqkv', 'wo', 'bo', 'ln1_g', 'ln1_b',
                'w1', 'b1', 'w2', 'b2', 'ln2_g', 'ln2_b')


# ---------------------------- in-kernel helpers ----------------------------

def _ln(x, g, b, n_valid):
    """LayerNorm over the first `n_valid` lanes of a lane-padded (rows, HP) tile.

    Padded lanes of g/b are zero, so padded output lanes stay exactly zero.
    """
    mean = jnp.sum(x, axis=-1, keepdims=True) * (1.0 / n_valid)
    lane = jax.lax.broadcasted_iota(jnp.int32, x.shape, 1)
    d = jnp.where(lane < n_valid, x - mean, 0.0)
    var = jnp.sum(d * d, axis=-1, keepdims=True) * (1.0 / n_valid)
    inv = jax.lax.rsqrt(var + EPS)
    return d * inv * g + b


# ---------------------------- fused Pallas kernel ----------------------------

def _fused_kernel(onehot_ids_ref, wemb_ref, pe_ref, te_ref, embg_ref, embb_ref,
                  wqkv_ref, bqkv_ref, wo_ref, bo_ref, ln1g_ref, ln1b_ref,
                  w1_ref, b1_ref, w2_ref, b2_ref, ln2g_ref, ln2b_ref,
                  cdw_ref, cdb_ref, cow_ref, cob_ref, olab_ref,
                  logits_ref, loss_ref, act_ref):
    """Whole RoBERTa forward; grid axis = encoder layer (activation in VMEM)."""
    l = pl.program_id(0)

    # ---- embeddings + LayerNorm (first grid step only) ----
    @pl.when(l == 0)
    def _():
        # word-embedding "gather" as a one-hot matmul (exact: one-hot rows)
        we = jnp.dot(onehot_ids_ref[...], wemb_ref[...],
                     preferred_element_type=jnp.float32)          # (BS, HP)
        pe = jnp.concatenate([pe_ref[...]] * B, axis=0)           # (BS, HP)
        x0 = we + pe + te_ref[...]
        act_ref[...] = _ln(x0, embg_ref[...], embb_ref[...], H)

    # ---- one encoder layer on the carried activation ----
    x = act_ref[...]                                              # (BS, HP) f32
    xb = x.astype(jnp.bfloat16)

    # fused, head-slot-aligned QKV projection: (BS, HP) @ (HP, 3*NH*128)
    qkv = jnp.dot(xb, wqkv_ref[0],
                  preferred_element_type=jnp.float32) + bqkv_ref[0]

    scale = 1.0 / (DH ** 0.5)
    ctx_rows = []
    for b in range(B):                                            # static batch loop
        r0 = b * S
        head_ctx = []
        for hd in range(NH):                                      # static head loop
            qo = (3 * hd + 0) * HSLOT
            ko = (3 * hd + 1) * HSLOT
            vo = (3 * hd + 2) * HSLOT
            qh = qkv[r0:r0 + S, qo:qo + HSLOT].astype(jnp.bfloat16)   # (S, 128)
            kh = qkv[r0:r0 + S, ko:ko + HSLOT].astype(jnp.bfloat16)
            vh = qkv[r0:r0 + S, vo:vo + HSLOT].astype(jnp.bfloat16)
            s = jax.lax.dot_general(qh, kh, (((1,), (1,)), ((), ())),
                                    preferred_element_type=jnp.float32) * scale
            s = s - jnp.max(s, axis=-1, keepdims=True)
            p = jnp.exp(s)
            p = p * pl.reciprocal(jnp.sum(p, axis=-1, keepdims=True), approx=True)
            ctx = jnp.dot(p.astype(jnp.bfloat16), vh,
                          preferred_element_type=jnp.float32)     # (S, 128)
            head_ctx.append(ctx)
        ctx_rows.append(jnp.concatenate(head_ctx, axis=-1))       # (S, NH*128)
    ctx_full = jnp.concatenate(ctx_rows, axis=0)                  # (BS, NH*128)

    # single fused output projection (head-slot aligned wo)
    attn = jnp.dot(ctx_full.astype(jnp.bfloat16), wo_ref[0],
                   preferred_element_type=jnp.float32) + bo_ref[0]

    x1 = _ln(attn + x, ln1g_ref[0], ln1b_ref[0], H)

    # feed-forward block
    h1 = jnp.dot(x1.astype(jnp.bfloat16), w1_ref[0],
                 preferred_element_type=jnp.float32) + b1_ref[0]
    h1 = jax.nn.gelu(h1, approximate=True)
    h2 = jnp.dot(h1.astype(jnp.bfloat16), w2_ref[0],
                 preferred_element_type=jnp.float32) + b2_ref[0]

    act_ref[...] = _ln(h2 + x1, ln2g_ref[0], ln2b_ref[0], H)

    # ---- classification head + loss (last grid step only) ----
    @pl.when(l == pl.num_programs(0) - 1)
    def _():
        xa = act_ref[...]                                         # (BS, HP)
        # <s> (first-token) features: rows 0, S, 2S, ...
        feat = jnp.concatenate([xa[b * S:b * S + 1, :] for b in range(B)],
                               axis=0)                            # (B, HP)
        h = jnp.tanh(jnp.dot(feat.astype(jnp.bfloat16), cdw_ref[...],
                             preferred_element_type=jnp.float32) + cdb_ref[...])
        # padded class lanes carry a -1e9 bias -> never win argmax / vanish in softmax
        logits = jnp.dot(h.astype(jnp.bfloat16), cow_ref[...],
                         preferred_element_type=jnp.float32) + cob_ref[...]
        logits_ref[...] = logits

        z = logits - jnp.max(logits, axis=-1, keepdims=True)
        lse = jnp.log(jnp.sum(jnp.exp(z), axis=-1, keepdims=True))
        logp = z - lse
        nll = -jnp.sum(olab_ref[...] * logp, axis=-1, keepdims=True)       # (B, 1)
        loss_ref[...] = jnp.sum(nll, axis=0, keepdims=True) * (1.0 / B)    # (1, 1)


# ---------------------------- pallas_call wrapper ----------------------------

def _resident_spec(arr):
    """Same block every grid step -> fetched once, stays VMEM-resident."""
    nd = arr.ndim
    return pl.BlockSpec(arr.shape, lambda l, _nd=nd: (0,) * _nd)


def _per_layer_spec(arr):
    """Stacked (NUM_LAYERS, ...) weight: pick the current layer's slab."""
    nd = arr.ndim
    return pl.BlockSpec((1,) + arr.shape[1:],
                        lambda l, _nd=nd: (l,) + (0,) * (_nd - 1))


def roberta_fused_call(params, onehot_ids, pe_rows, onehot_labels):
    lp = params['layers']
    resident_in = [onehot_ids, params['word_emb'], pe_rows, params['type_emb'],
                   params['emb_ln_g'], params['emb_ln_b']]
    layer_in = [lp[name] for name in _LAYER_ORDER]
    head_in = [params['cls_dense_w'], params['cls_dense_b'],
               params['cls_out_w'], params['cls_out_b'], onehot_labels]

    in_specs = ([_resident_spec(a) for a in resident_in]
                + [_per_layer_spec(a) for a in layer_in]
                + [_resident_spec(a) for a in head_in])

    # NOTE(v7x @ real roberta-base sizes): add pipeline_mode=pl.Buffered(1) to the
    # resident weight specs and set vmem_limit_bytes; unnecessary at this toy size.
    return pl.pallas_call(
        _fused_kernel,
        grid=(NUM_LAYERS,),
        in_specs=in_specs,
        out_specs=(pl.BlockSpec((B, CP), lambda l: (0, 0)),
                   pl.BlockSpec((1, 1), lambda l: (0, 0))),
        out_shape=(jax.ShapeDtypeStruct((B, CP), jnp.float32),
                   jax.ShapeDtypeStruct((1, 1), jnp.float32)),
        scratch_shapes=[pltpu.VMEM((BS, HP), jnp.float32)],
        compiler_params=pltpu.CompilerParams(
            dimension_semantics=("arbitrary",)),
    )(*resident_in, *layer_in, *head_in)


# ------------------------- parameters & forward -------------------------

def init_params(key):
    n_rand = 3 + 6 * NUM_LAYERS + 2
    keys = jax.random.split(key, n_rand)
    it = iter(keys)

    def nrm(shape):
        return 0.02 * jax.random.normal(next(it), shape, jnp.float32)

    def padmat(a, rows, cols, dtype=jnp.float32):
        out = jnp.zeros((rows, cols), jnp.float32)
        out = out.at[:a.shape[0], :a.shape[1]].set(a)
        return out.astype(dtype)

    def padvec(v, cols, fill=0.0, dtype=jnp.float32):
        out = jnp.full((1, cols), fill, jnp.float32)
        out = out.at[0, :v.shape[0]].set(v)
        return out.astype(dtype)

    params = {
        # vocab padded to 128 rows so the in-kernel one-hot matmul gather works
        'word_emb': padmat(nrm((VOCAB, H)), 128, HP),
        'pos_emb': padmat(nrm((MAX_POS, H)), MAX_POS, HP),
        'type_emb': padvec(nrm((H,)), HP),
        'emb_ln_g': padvec(jnp.ones((H,), jnp.float32), HP),
        'emb_ln_b': padvec(jnp.zeros((H,), jnp.float32), HP),
        'cls_dense_w': padmat(nrm((H, H)), HP, HP, jnp.bfloat16),
        'cls_dense_b': padvec(jnp.zeros((H,), jnp.float32), HP),
        'cls_out_w': padmat(nrm((H, NUM_CLASSES)), HP, CP, jnp.bfloat16),
        'cls_out_b': padvec(jnp.zeros((NUM_CLASSES,), jnp.float32), CP, fill=-1e9),
    }

    per_layer = {name: [] for name in _LAYER_ORDER}
    for _ in range(NUM_LAYERS):
        wq, wk, wv = nrm((H, H)), nrm((H, H)), nrm((H, H))
        wo = nrm((H, H))
        # head-slot-aligned fused QKV: each head's Q/K/V in its own 128-lane slot
        wqkv = jnp.zeros((HP, QKVW), jnp.float32)
        wo_slot = jnp.zeros((NH * HSLOT, HP), jnp.float32)
        for hd in range(NH):
            cq = wq[:, hd * DH:(hd + 1) * DH]
            ck = wk[:, hd * DH:(hd + 1) * DH]
            cv = wv[:, hd * DH:(hd + 1) * DH]
            wqkv = wqkv.at[:H, (3 * hd + 0) * HSLOT:(3 * hd + 0) * HSLOT + DH].set(cq)
            wqkv = wqkv.at[:H, (3 * hd + 1) * HSLOT:(3 * hd + 1) * HSLOT + DH].set(ck)
            wqkv = wqkv.at[:H, (3 * hd + 2) * HSLOT:(3 * hd + 2) * HSLOT + DH].set(cv)
            wo_slot = wo_slot.at[hd * HSLOT:hd * HSLOT + DH, :H].set(
                wo[hd * DH:(hd + 1) * DH, :])
        per_layer['wqkv'].append(wqkv.astype(jnp.bfloat16))
        per_layer['bqkv'].append(jnp.zeros((1, QKVW), jnp.float32))
        per_layer['wo'].append(wo_slot.astype(jnp.bfloat16))
        per_layer['bo'].append(padvec(jnp.zeros((H,), jnp.float32), HP))
        per_layer['ln1_g'].append(padvec(jnp.ones((H,), jnp.float32), HP))
        per_layer['ln1_b'].append(padvec(jnp.zeros((H,), jnp.float32), HP))
        per_layer['w1'].append(padmat(nrm((H, FFN)), HP, FP, jnp.bfloat16))
        per_layer['b1'].append(padvec(jnp.zeros((FFN,), jnp.float32), FP))
        per_layer['w2'].append(padmat(nrm((FFN, H)), FP, HP, jnp.bfloat16))
        per_layer['b2'].append(padvec(jnp.zeros((H,), jnp.float32), HP))
        per_layer['ln2_g'].append(padvec(jnp.ones((H,), jnp.float32), HP))
        per_layer['ln2_b'].append(padvec(jnp.zeros((H,), jnp.float32), HP))

    params['layers'] = {name: jnp.stack(per_layer[name], axis=0)
                        for name in _LAYER_ORDER}
    return params


@functools.partial(jax.jit, static_argnames=('training',))
def roberta_forward(params, input_ids, labels, full_id, training=False):
    # XLA glue is only two tiny one-hot constructions and a static pos-emb slice;
    # everything else (gather matmul, LN, layers, head, loss) runs in one kernel.
    onehot_ids = jax.nn.one_hot(input_ids.reshape(-1), 128, dtype=jnp.float32)
    pe_rows = params['pos_emb'][2:2 + S, :]          # RoBERTa position offset (+2)
    onehot_labels = jax.nn.one_hot(labels, CP, dtype=jnp.float32)

    logits, loss = roberta_fused_call(params, onehot_ids, pe_rows, onehot_labels)

    if training:
        return loss[0, 0]
    preds = jnp.argmax(logits[:, :NUM_CLASSES], axis=1)
    return preds, full_id


if __name__ == "__main__":
    root = jax.random.PRNGKey(0)
    k_param, k_ids, k_lbl = jax.random.split(root, 3)

    params = init_params(k_param)
    input_ids = jax.random.randint(k_ids, (B, S), 0, VOCAB, dtype=jnp.int32)
    labels = jax.random.randint(k_lbl, (B,), 0, NUM_CLASSES, dtype=jnp.int32)
    full_id = jnp.arange(B, dtype=jnp.int32)

    # eval-mode forward: (preds, fullID)
    preds, fid = roberta_forward(params, input_ids, labels, full_id, training=False)
    # training-mode forward: scalar cross-entropy loss
    loss = roberta_forward(params, input_ids, labels, full_id, training=True)

    jax.block_until_ready((preds, fid, loss))
    print("KERNEL_OK")
</pallas_src>

<mosaic_0001>
module attributes {stable_mosaic.version = 11 : i64} {
  func.func @_fused_kernel(%arg0: i32, %arg1: memref<16x128xf32, #tpu.memory_space<vmem>>, %arg2: memref<128x128xf32, #tpu.memory_space<vmem>>, %arg3: memref<8x128xf32, #tpu.memory_space<vmem>>, %arg4: memref<1x128xf32, #tpu.memory_space<vmem>>, %arg5: memref<1x128xf32, #tpu.memory_space<vmem>>, %arg6: memref<1x128xf32, #tpu.memory_space<vmem>>, %arg7: memref<1x128x768xbf16, #tpu.memory_space<vmem>>, %arg8: memref<1x1x768xf32, #tpu.memory_space<vmem>>, %arg9: memref<1x256x128xbf16, #tpu.memory_space<vmem>>, %arg10: memref<1x1x128xf32, #tpu.memory_space<vmem>>, %arg11: memref<1x1x128xf32, #tpu.memory_space<vmem>>, %arg12: memref<1x1x128xf32, #tpu.memory_space<vmem>>, %arg13: memref<1x128x128xbf16, #tpu.memory_space<vmem>>, %arg14: memref<1x1x128xf32, #tpu.memory_space<vmem>>, %arg15: memref<1x128x128xbf16, #tpu.memory_space<vmem>>, %arg16: memref<1x1x128xf32, #tpu.memory_space<vmem>>, %arg17: memref<1x1x128xf32, #tpu.memory_space<vmem>>, %arg18: memref<1x1x128xf32, #tpu.memory_space<vmem>>, %arg19: memref<128x128xbf16, #tpu.memory_space<vmem>>, %arg20: memref<1x128xf32, #tpu.memory_space<vmem>>, %arg21: memref<128x128xbf16, #tpu.memory_space<vmem>>, %arg22: memref<1x128xf32, #tpu.memory_space<vmem>>, %arg23: memref<2x128xf32, #tpu.memory_space<vmem>>, %arg24: memref<2x128xf32, #tpu.memory_space<vmem>>, %arg25: memref<1x1xf32, #tpu.memory_space<vmem>>, %arg26: memref<16x128xf32, #tpu.memory_space<vmem>>) attributes {dimension_semantics = [#tpu.dimension_semantics<arbitrary>], iteration_bounds = array<i64: 2>, scalar_prefetch = 0 : i64, scratch_operands = 1 : i64, tpu.core_type = #tpu.core_type<tc>, window_params = [{pipeline_mode = #tpu.pipeline_mode<synchronous>, transform_indices = @transform_0, window_bounds = array<i64: 16, 128>}, {pipeline_mode = #tpu.pipeline_mode<synchronous>, transform_indices = @transform_1, window_bounds = array<i64: 128, 128>}, {pipeline_mode = #tpu.pipeline_mode<synchronous>, transform_indices = @transform_2, window_bounds = array<i64: 8, 128>}, {pipeline_mode = #tpu.pipeline_mode<synchronous>, transform_indices = @transform_3, window_bounds = array<i64: 1, 128>}, {pipeline_mode = #tpu.pipeline_mode<synchronous>, transform_indices = @transform_4, window_bounds = array<i64: 1, 128>}, {pipeline_mode = #tpu.pipeline_mode<synchronous>, transform_indices = @transform_5, window_bounds = array<i64: 1, 128>}, {transform_indices = @transform_6, window_bounds = array<i64: 1, 128, 768>}, {transform_indices = @transform_7, window_bounds = array<i64: 1, 1, 768>}, {transform_indices = @transform_8, window_bounds = array<i64: 1, 256, 128>}, {transform_indices = @transform_9, window_bounds = array<i64: 1, 1, 128>}, {transform_indices = @transform_10, window_bounds = array<i64: 1, 1, 128>}, {transform_indices = @transform_11, window_bounds = array<i64: 1, 1, 128>}, {transform_indices = @transform_12, window_bounds = array<i64: 1, 128, 128>}, {transform_indices = @transform_13, window_bounds = array<i64: 1, 1, 128>}, {transform_indices = @transform_14, window_bounds = array<i64: 1, 128, 128>}, {transform_indices = @transform_15, window_bounds = array<i64: 1, 1, 128>}, {transform_indices = @transform_16, window_bounds = array<i64: 1, 1, 128>}, {transform_indices = @transform_17, window_bounds = array<i64: 1, 1, 128>}, {pipeline_mode = #tpu.pipeline_mode<synchronous>, transform_indices = @transform_18, window_bounds = array<i64: 128, 128>}, {pipeline_mode = #tpu.pipeline_mode<synchronous>, transform_indices = @transform_19, window_bounds = array<i64: 1, 128>}, {pipeline_mode = #tpu.pipeline_mode<synchronous>, transform_indices = @transform_20, window_bounds = array<i64: 128, 128>}, {pipeline_mode = #tpu.pipeline_mode<synchronous>, transform_indices = @transform_21, window_bounds = array<i64: 1, 128>}, {pipeline_mode = #tpu.pipeline_mode<synchronous>, transform_indices = @transform_22, window_bounds = array<i64: 2, 128>}, {pipeline_mode = #tpu.pipeline_mode<synchronous>, transform_indices = @transform_23, window_bounds = array<i64: 2, 128>}, {pipeline_mode = #tpu.pipeline_mode<synchronous>, transform_indices = @transform_24, window_bounds = array<i64: 1, 1>}]} {
    %c0_i32 = arith.constant 0 : i32
    %0 = arith.cmpi eq, %arg0, %c0_i32 : i32
    %1 = arith.extui %0 : i1 to i32
    %c0_i32_0 = arith.constant 0 : i32
    %2 = arith.cmpi ne, %1, %c0_i32_0 : i32
    scf.if %2 {
      %c0_81 = arith.constant 0 : index
      %c0_82 = arith.constant 0 : index
      %200 = vector.load %arg1[%c0_81, %c0_82] : memref<16x128xf32, #tpu.memory_space<vmem>>, vector<16x128xf32>
      %c0_83 = arith.constant 0 : index
      %c0_84 = arith.constant 0 : index
      %201 = vector.load %arg2[%c0_83, %c0_84] : memref<128x128xf32, #tpu.memory_space<vmem>>, vector<128x128xf32>
      %cst_85 = arith.constant dense<0.000000e+00> : vector<16x128xf32>
      %202 = tpu.matmul %200, %201, %cst_85 {dimension_numbers = #tpu.dot_dimension_numbers<[1], [0], [0], [1], [0, 0, 1, 1], [], []>} : vector<16x128xf32>, vector<128x128xf32>, vector<16x128xf32> -> vector<16x128xf32>
      %c0_86 = arith.constant 0 : index
      %c0_87 = arith.constant 0 : index
      %203 = vector.load %arg3[%c0_86, %c0_87] : memref<8x128xf32, #tpu.memory_space<vmem>>, vector<8x128xf32>
      %204 = tpu.concatenate %203, %203 in 0 : vector<8x128xf32>, vector<8x128xf32> -> vector<16x128xf32>
      %205 = arith.addf %202, %204 : vector<16x128xf32>
      %c0_88 = arith.constant 0 : index
      %c0_89 = arith.constant 0 : index
      %206 = vector.load %arg4[%c0_88, %c0_89] : memref<1x128xf32, #tpu.memory_space<vmem>>, vector<1x128xf32>
      %207 = vector.broadcast %206 : vector<1x128xf32> to vector<16x128xf32>
      %208 = arith.addf %205, %207 : vector<16x128xf32>
      %c0_90 = arith.constant 0 : index
      %c0_91 = arith.constant 0 : index
      %209 = vector.load %arg5[%c0_90, %c0_91] : memref<1x128xf32, #tpu.memory_space<vmem>>, vector<1x128xf32>
      %c0_92 = arith.constant 0 : index
      %c0_93 = arith.constant 0 : index
      %210 = vector.load %arg6[%c0_92, %c0_93] : memref<1x128xf32, #tpu.memory_space<vmem>>, vector<1x128xf32>
      %cst_94 = arith.constant dense<0.000000e+00> : vector<16xf32>
      %211 = vector.multi_reduction <add>, %208, %cst_94 [1] : vector<16x128xf32> to vector<16xf32>
      %212 = vector.shape_cast %211 : vector<16xf32> to vector<16x1xf32>
      %cst_95 = arith.constant 3.125000e-02 : f32
      %213 = vector.broadcast %cst_95 : f32 to vector<16x1xf32>
      %214 = arith.mulf %212, %213 : vector<16x1xf32>
      %215 = tpu.iota {dimensions = array<i32: 1>} : vector<16x128xi32>
      %c32_i32_96 = arith.constant 32 : i32
      %216 = vector.broadcast %c32_i32_96 : i32 to vector<16x128xi32>
      %217 = arith.cmpi slt, %215, %216 : vector<16x128xi32>
      %218 = vector.broadcast %214 : vector<16x1xf32> to vector<16x128xf32>
      %219 = arith.subf %208, %218 : vector<16x128xf32>
      %cst_97 = arith.constant 0.000000e+00 : f32
      %220 = vector.broadcast %cst_97 : f32 to vector<16x128xf32>
      %221 = arith.select %217, %219, %220 : vector<16x128xi1>, vector<16x128xf32>
      %222 = arith.mulf %221, %221 : vector<16x128xf32>
      %cst_98 = arith.constant dense<0.000000e+00> : vector<16xf32>
      %223 = vector.multi_reduction <add>, %222, %cst_98 [1] : vector<16x128xf32> to vector<16xf32>
      %224 = vector.shape_cast %223 : vector<16xf32> to vector<16x1xf32>
      %cst_99 = arith.constant 3.125000e-02 : f32
      %225 = vector.broadcast %cst_99 : f32 to vector<16x1xf32>
      %226 = arith.mulf %224, %225 : vector<16x1xf32>
      %cst_100 = arith.constant 9.99999974E-6 : f32
      %227 = vector.broadcast %cst_100 : f32 to vector<16x1xf32>
      %228 = arith.addf %226, %227 : vector<16x1xf32>
      %229 = math.rsqrt %228 : vector<16x1xf32>
      %230 = vector.broadcast %229 : vector<16x1xf32> to vector<16x128xf32>
      %231 = arith.mulf %221, %230 : vector<16x128xf32>
      %232 = vector.broadcast %209 : vector<1x128xf32> to vector<16x128xf32>
      %233 = arith.mulf %231, %232 : vector<16x128xf32>
      %234 = vector.broadcast %210 : vector<1x128xf32> to vector<16x128xf32>
      %235 = arith.addf %233, %234 : vector<16x128xf32>
      %c0_101 = arith.constant 0 : index
      %c0_102 = arith.constant 0 : index
      %236 = vector.load %arg26[%c0_101, %c0_102] : memref<16x128xf32, #tpu.memory_space<vmem>>, vector<16x128xf32>
      tpu.vector_store %arg26[%c0_101, %c0_102], %235 {strides = array<i32>} : memref<16x128xf32, #tpu.memory_space<vmem>>, vector<16x128xf32>,
    } else {
    }
    %c0 = arith.constant 0 : index
    %c0_1 = arith.constant 0 : index
    %3 = vector.load %arg26[%c0, %c0_1] : memref<16x128xf32, #tpu.memory_space<vmem>>, vector<16x128xf32>
    %4 = arith.truncf %3 : vector<16x128xf32> to vector<16x128xbf16>
    %c0_2 = arith.constant 0 : index
    %c0_3 = arith.constant 0 : index
    %c0_4 = arith.constant 0 : index
    %5 = vector.load %arg7[%c0_2, %c0_3, %c0_4] : memref<1x128x768xbf16, #tpu.memory_space<vmem>>, vector<1x128x768xbf16>
    %6 = vector.shape_cast %5 : vector<1x128x768xbf16> to vector<128x768xbf16>
    %cst = arith.constant dense<0.000000e+00> : vector<16x768xf32>
    %7 = tpu.matmul %4, %6, %cst {dimension_numbers = #tpu.dot_dimension_numbers<[1], [0], [0], [1], [0, 0, 1, 1], [], []>} : vector<16x128xbf16>, vector<128x768xbf16>, vector<16x768xf32> -> vector<16x768xf32>
    %c0_5 = arith.constant 0 : index
    %c0_6 = arith.constant 0 : index
    %c0_7 = arith.constant 0 : index
    %8 = vector.load %arg8[%c0_5, %c0_6, %c0_7] : memref<1x1x768xf32, #tpu.memory_space<vmem>>, vector<1x1x768xf32>
    %9 = vector.shape_cast %8 : vector<1x1x768xf32> to vector<1x768xf32>
    %10 = vector.broadcast %9 : vector<1x768xf32> to vector<16x768xf32>
    %11 = arith.addf %7, %10 : vector<16x768xf32>
    %12 = vector.extract_strided_slice %11 {offsets = [0, 0], sizes = [8, 128], strides = [1, 1]} : vector<16x768xf32> to vector<8x128xf32>
    %13 = arith.truncf %12 : vector<8x128xf32> to vector<8x128xbf16>
    %14 = vector.extract_strided_slice %11 {offsets = [0, 128], sizes = [8, 128], strides = [1, 1]} : vector<16x768xf32> to vector<8x128xf32>
    %15 = arith.truncf %14 : vector<8x128xf32> to vector<8x128xbf16>
    %16 = vector.extract_strided_slice %11 {offsets = [0, 256], sizes = [8, 128], strides = [1, 1]} : vector<16x768xf32> to vector<8x128xf32>
    %17 = arith.truncf %16 : vector<8x128xf32> to vector<8x128xbf16>
    %cst_8 = arith.constant dense<0.000000e+00> : vector<8x8xf32>
    %18 = tpu.matmul %13, %15, %cst_8 {dimension_numbers = #tpu.dot_dimension_numbers<[1], [1], [0], [0], [0, 0, 1, 0], [], []>} : vector<8x128xbf16>, vector<8x128xbf16>, vector<8x8xf32> -> vector<8x8xf32>
    %cst_9 = arith.constant 2.500000e-01 : f32
    %19 = vector.broadcast %cst_9 : f32 to vector<8x8xf32>
    %20 = arith.mulf %18, %19 : vector<8x8xf32>
    %cst_10 = arith.constant dense<0xFF800000> : vector<8xf32>
    %21 = vector.multi_reduction <maximumf>, %20, %cst_10 [1] : vector<8x8xf32> to vector<8xf32>
    %22 = vector.shape_cast %21 : vector<8xf32> to vector<8x1xf32>
    %23 = vector.broadcast %22 : vector<8x1xf32> to vector<8x8xf32>
    %24 = arith.subf %20, %23 : vector<8x8xf32>
    %25 = math.exp %24 : vector<8x8xf32>
    %cst_11 = arith.constant dense<0.000000e+00> : vector<8xf32>
    %26 = vector.multi_reduction <add>, %25, %cst_11 [1] : vector<8x8xf32> to vector<8xf32>
    %27 = vector.shape_cast %26 : vector<8xf32> to vector<8x1xf32>
    %28 = tpu.reciprocal %27 {approx = true} : vector<8x1xf32> -> vector<8x1xf32>
    %29 = vector.broadcast %28 : vector<8x1xf32> to vector<8x8xf32>
    %30 = arith.mulf %25, %29 : vector<8x8xf32>
    %31 = arith.truncf %30 : vector<8x8xf32> to vector<8x8xbf16>
    %cst_12 = arith.constant dense<0.000000e+00> : vector<8x128xf32>
    %32 = tpu.matmul %31, %17, %cst_12 {dimension_numbers = #tpu.dot_dimension_numbers<[1], [0], [0], [1], [0, 0, 1, 1], [], []>} : vector<8x8xbf16>, vector<8x128xbf16>, vector<8x128xf32> -> vector<8x128xf32>
    %33 = vector.extract_strided_slice %11 {offsets = [0, 384], sizes = [8, 128], strides = [1, 1]} : vector<16x768xf32> to vector<8x128xf32>
    %34 = arith.truncf %33 : vector<8x128xf32> to vector<8x128xbf16>
    %35 = vector.extract_strided_slice %11 {offsets = [0, 512], sizes = [8, 128], strides = [1, 1]} : vector<16x768xf32> to vector<8x128xf32>
    %36 = arith.truncf %35 : vector<8x128xf32> to vector<8x128xbf16>
    %37 = vector.extract_strided_slice %11 {offsets = [0, 640], sizes = [8, 128], strides = [1, 1]} : vector<16x768xf32> to vector<8x128xf32>
    %38 = arith.truncf %37 : vector<8x128xf32> to vector<8x128xbf16>
    %cst_13 = arith.constant dense<0.000000e+00> : vector<8x8xf32>
    %39 = tpu.matmul %34, %36, %cst_13 {dimension_numbers = #tpu.dot_dimension_numbers<[1], [1], [0], [0], [0, 0, 1, 0], [], []>} : vector<8x128xbf16>, vector<8x128xbf16>, vector<8x8xf32> -> vector<8x8xf32>
    %cst_14 = arith.constant 2.500000e-01 : f32
    %40 = vector.broadcast %cst_14 : f32 to vector<8x8xf32>
    %41 = arith.mulf %39, %40 : vector<8x8xf32>
    %cst_15 = arith.constant dense<0xFF800000> : vector<8xf32>
    %42 = vector.multi_reduction <maximumf>, %41, %cst_15 [1] : vector<8x8xf32> to vector<8xf32>
    %43 = vector.shape_cast %42 : vector<8xf32> to vector<8x1xf32>
    %44 = vector.broadcast %43 : vector<8x1xf32> to vector<8x8xf32>
    %45 = arith.subf %41, %44 : vector<8x8xf32>
    %46 = math.exp %45 : vector<8x8xf32>
    %cst_16 = arith.constant dense<0.000000e+00> : vector<8xf32>
    %47 = vector.multi_reduction <add>, %46, %cst_16 [1] : vector<8x8xf32> to vector<8xf32>
    %48 = vector.shape_cast %47 : vector<8xf32> to vector<8x1xf32>
    %49 = tpu.reciprocal %48 {approx = true} : vector<8x1xf32> -> vector<8x1xf32>
    %50 = vector.broadcast %49 : vector<8x1xf32> to vector<8x8xf32>
    %51 = arith.mulf %46, %50 : vector<8x8xf32>
    %52 = arith.truncf %51 : vector<8x8xf32> to vector<8x8xbf16>
    %cst_17 = arith.constant dense<0.000000e+00> : vector<8x128xf32>
    %53 = tpu.matmul %52, %38, %cst_17 {dimension_numbers = #tpu.dot_dimension_numbers<[1], [0], [0], [1], [0, 0, 1, 1], [], []>} : vector<8x8xbf16>, vector<8x128xbf16>, vector<8x128xf32> -> vector<8x128xf32>
    %54 = tpu.concatenate %32, %53 in 1 : vector<8x128xf32>, vector<8x128xf32> -> vector<8x256xf32>
    %55 = vector.extract_strided_slice %11 {offsets = [8, 0], sizes = [8, 128], strides = [1, 1]} : vector<16x768xf32> to vector<8x128xf32>
    %56 = arith.truncf %55 : vector<8x128xf32> to vector<8x128xbf16>
    %57 = vector.extract_strided_slice %11 {offsets = [8, 128], sizes = [8, 128], strides = [1, 1]} : vector<16x768xf32> to vector<8x128xf32>
    %58 = arith.truncf %57 : vector<8x128xf32> to vector<8x128xbf16>
    %59 = vector.extract_strided_slice %11 {offsets = [8, 256], sizes = [8, 128], strides = [1, 1]} : vector<16x768xf32> to vector<8x128xf32>
    %60 = arith.truncf %59 : vector<8x128xf32> to vector<8x128xbf16>
    %cst_18 = arith.constant dense<0.000000e+00> : vector<8x8xf32>
    %61 = tpu.matmul %56, %58, %cst_18 {dimension_numbers = #tpu.dot_dimension_numbers<[1], [1], [0], [0], [0, 0, 1, 0], [], []>} : vector<8x128xbf16>, vector<8x128xbf16>, vector<8x8xf32> -> vector<8x8xf32>
    %cst_19 = arith.constant 2.500000e-01 : f32
    %62 = vector.broadcast %cst_19 : f32 to vector<8x8xf32>
    %63 = arith.mulf %61, %62 : vector<8x8xf32>
    %cst_20 = arith.constant dense<0xFF800000> : vector<8xf32>
    %64 = vector.multi_reduction <maximumf>, %63, %cst_20 [1] : vector<8x8xf32> to vector<8xf32>
    %65 = vector.shape_cast %64 : vector<8xf32> to vector<8x1xf32>
    %66 = vector.broadcast %65 : vector<8x1xf32> to vector<8x8xf32>
    %67 = arith.subf %63, %66 : vector<8x8xf32>
    %68 = math.exp %67 : vector<8x8xf32>
    %cst_21 = arith.constant dense<0.000000e+00> : vector<8xf32>
    %69 = vector.multi_reduction <add>, %68, %cst_21 [1] : vector<8x8xf32> to vector<8xf32>
    %70 = vector.shape_cast %69 : vector<8xf32> to vector<8x1xf32>
    %71 = tpu.reciprocal %70 {approx = true} : vector<8x1xf32> -> vector<8x1xf32>
    %72 = vector.broadcast %71 : vector<8x1xf32> to vector<8x8xf32>
    %73 = arith.mulf %68, %72 : vector<8x8xf32>
    %74 = arith.truncf %73 : vector<8x8xf32> to vector<8x8xbf16>
    %cst_22 = arith.constant dense<0.000000e+00> : vector<8x128xf32>
    %75 = tpu.matmul %74, %60, %cst_22 {dimension_numbers = #tpu.dot_dimension_numbers<[1], [0], [0], [1], [0, 0, 1, 1], [], []>} : vector<8x8xbf16>, vector<8x128xbf16>, vector<8x128xf32> -> vector<8x128xf32>
    %76 = vector.extract_strided_slice %11 {offsets = [8, 384], sizes = [8, 128], strides = [1, 1]} : vector<16x768xf32> to vector<8x128xf32>
    %77 = arith.truncf %76 : vector<8x128xf32> to vector<8x128xbf16>
    %78 = vector.extract_strided_slice %11 {offsets = [8, 512], sizes = [8, 128], strides = [1, 1]} : vector<16x768xf32> to vector<8x128xf32>
    %79 = arith.truncf %78 : vector<8x128xf32> to vector<8x128xbf16>
    %80 = vector.extract_strided_slice %11 {offsets = [8, 640], sizes = [8, 128], strides = [1, 1]} : vector<16x768xf32> to vector<8x128xf32>
    %81 = arith.truncf %80 : vector<8x128xf32> to vector<8x128xbf16>
    %cst_23 = arith.constant dense<0.000000e+00> : vector<8x8xf32>
    %82 = tpu.matmul %77, %79, %cst_23 {dimension_numbers = #tpu.dot_dimension_numbers<[1], [1], [0], [0], [0, 0, 1, 0], [], []>} : vector<8x128xbf16>, vector<8x128xbf16>, vector<8x8xf32> -> vector<8x8xf32>
    %cst_24 = arith.constant 2.500000e-01 : f32
    %83 = vector.broadcast %cst_24 : f32 to vector<8x8xf32>
    %84 = arith.mulf %82, %83 : vector<8x8xf32>
    %cst_25 = arith.constant dense<0xFF800000> : vector<8xf32>
    %85 = vector.multi_reduction <maximumf>, %84, %cst_25 [1] : vector<8x8xf32> to vector<8xf32>
    %86 = vector.shape_cast %85 : vector<8xf32> to vector<8x1xf32>
    %87 = vector.broadcast %86 : vector<8x1xf32> to vector<8x8xf32>
    %88 = arith.subf %84, %87 : vector<8x8xf32>
    %89 = math.exp %88 : vector<8x8xf32>
    %cst_26 = arith.constant dense<0.000000e+00> : vector<8xf32>
    %90 = vector.multi_reduction <add>, %89, %cst_26 [1] : vector<8x8xf32> to vector<8xf32>
    %91 = vector.shape_cast %90 : vector<8xf32> to vector<8x1xf32>
    %92 = tpu.reciprocal %91 {approx = true} : vector<8x1xf32> -> vector<8x1xf32>
    %93 = vector.broadcast %92 : vector<8x1xf32> to vector<8x8xf32>
    %94 = arith.mulf %89, %93 : vector<8x8xf32>
    %95 = arith.truncf %94 : vector<8x8xf32> to vector<8x8xbf16>
    %cst_27 = arith.constant dense<0.000000e+00> : vector<8x128xf32>
    %96 = tpu.matmul %95, %81, %cst_27 {dimension_numbers = #tpu.dot_dimension_numbers<[1], [0], [0], [1], [0, 0, 1, 1], [], []>} : vector<8x8xbf16>, vector<8x128xbf16>, vector<8x128xf32> -> vector<8x128xf32>
    %97 = tpu.concatenate %75, %96 in 1 : vector<8x128xf32>, vector<8x128xf32> -> vector<8x256xf32>
    %98 = tpu.concatenate %54, %97 in 0 : vector<8x256xf32>, vector<8x256xf32> -> vector<16x256xf32>
    %99 = arith.truncf %98 : vector<16x256xf32> to vector<16x256xbf16>
    %c0_28 = arith.constant 0 : index
    %c0_29 = arith.constant 0 : index
    %c0_30 = arith.constant 0 : index
    %100 = vector.load %arg9[%c0_28, %c0_29, %c0_30] : memref<1x256x128xbf16, #tpu.memory_space<vmem>>, vector<1x256x128xbf16>
    %101 = vector.shape_cast %100 : vector<1x256x128xbf16> to vector<256x128xbf16>
    %cst_31 = arith.constant dense<0.000000e+00> : vector<16x128xf32>
    %102 = tpu.matmul %99, %101, %cst_31 {dimension_numbers = #tpu.dot_dimension_numbers<[1], [0], [0], [1], [0, 0, 1, 1], [], []>} : vector<16x256xbf16>, vector<256x128xbf16>, vector<16x128xf32> -> vector<16x128xf32>
    %c0_32 = arith.constant 0 : index
    %c0_33 = arith.constant 0 : index
    %c0_34 = arith.constant 0 : index
    %103 = vector.load %arg10[%c0_32, %c0_33, %c0_34] : memref<1x1x128xf32, #tpu.memory_space<vmem>>, vector<1x1x128xf32>
    %104 = vector.shape_cast %103 : vector<1x1x128xf32> to vector<1x128xf32>
    %105 = vector.broadcast %104 : vector<1x128xf32> to vector<16x128xf32>
    %106 = arith.addf %102, %105 : vector<16x128xf32>
    %107 = arith.addf %106, %3 : vector<16x128xf32>
    %c0_35 = arith.constant 0 : index
    %c0_36 = arith.constant 0 : index
    %c0_37 = arith.constant 0 : index
    %108 = vector.load %arg11[%c0_35, %c0_36, %c0_37] : memref<1x1x128xf32, #tpu.memory_space<vmem>>, vector<1x1x128xf32>
    %109 = vector.shape_cast %108 : vector<1x1x128xf32> to vector<1x128xf32>
    %c0_38 = arith.constant 0 : index
    %c0_39 = arith.constant 0 : index
    %c0_40 = arith.constant 0 : index
    %110 = vector.load %arg12[%c0_38, %c0_39, %c0_40] : memref<1x1x128xf32, #tpu.memory_space<vmem>>, vector<1x1x128xf32>
    %111 = vector.shape_cast %110 : vector<1x1x128xf32> to vector<1x128xf32>
    %cst_41 = arith.constant dense<0.000000e+00> : vector<16xf32>
    %112 = vector.multi_reduction <add>, %107, %cst_41 [1] : vector<16x128xf32> to vector<16xf32>
    %113 = vector.shape_cast %112 : vector<16xf32> to vector<16x1xf32>
    %cst_42 = arith.constant 3.125000e-02 : f32
    %114 = vector.broadcast %cst_42 : f32 to vector<16x1xf32>
    %115 = arith.mulf %113, %114 : vector<16x1xf32>
    %116 = tpu.iota {dimensions = array<i32: 1>} : vector<16x128xi32>
    %c32_i32 = arith.constant 32 : i32
    %117 = vector.broadcast %c32_i32 : i32 to vector<16x128xi32>
    %118 = arith.cmpi slt, %116, %117 : vector<16x128xi32>
    %119 = vector.broadcast %115 : vector<16x1xf32> to vector<16x128xf32>
    %120 = arith.subf %107, %119 : vector<16x128xf32>
    %cst_43 = arith.constant 0.000000e+00 : f32
    %121 = vector.broadcast %cst_43 : f32 to vector<16x128xf32>
    %122 = arith.select %118, %120, %121 : vector<16x128xi1>, vector<16x128xf32>
    %123 = arith.mulf %122, %122 : vector<16x128xf32>
    %cst_44 = arith.constant dense<0.000000e+00> : vector<16xf32>
    %124 = vector.multi_reduction <add>, %123, %cst_44 [1] : vector<16x128xf32> to vector<16xf32>
    %125 = vector.shape_cast %124 : vector<16xf32> to vector<16x1xf32>
    %cst_45 = arith.constant 3.125000e-02 : f32
    %126 = vector.broadcast %cst_45 : f32 to vector<16x1xf32>
    %127 = arith.mulf %125, %126 : vector<16x1xf32>
    %cst_46 = arith.constant 9.99999974E-6 : f32
    %128 = vector.broadcast %cst_46 : f32 to vector<16x1xf32>
    %129 = arith.addf %127, %128 : vector<16x1xf32>
    %130 = math.rsqrt %129 : vector<16x1xf32>
    %131 = vector.broadcast %130 : vector<16x1xf32> to vector<16x128xf32>
    %132 = arith.mulf %122, %131 : vector<16x128xf32>
    %133 = vector.broadcast %109 : vector<1x128xf32> to vector<16x128xf32>
    %134 = arith.mulf %132, %133 : vector<16x128xf32>
    %135 = vector.broadcast %111 : vector<1x128xf32> to vector<16x128xf32>
    %136 = arith.addf %134, %135 : vector<16x128xf32>
    %137 = arith.truncf %136 : vector<16x128xf32> to vector<16x128xbf16>
    %c0_47 = arith.constant 0 : index
    %c0_48 = arith.constant 0 : index
    %c0_49 = arith.constant 0 : index
    %138 = vector.load %arg13[%c0_47, %c0_48, %c0_49] : memref<1x128x128xbf16, #tpu.memory_space<vmem>>, vector<1x128x128xbf16>
    %139 = vector.shape_cast %138 : vector<1x128x128xbf16> to vector<128x128xbf16>
    %cst_50 = arith.constant dense<0.000000e+00> : vector<16x128xf32>
    %140 = tpu.matmul %137, %139, %cst_50 {dimension_numbers = #tpu.dot_dimension_numbers<[1], [0], [0], [1], [0, 0, 1, 1], [], []>} : vector<16x128xbf16>, vector<128x128xbf16>, vector<16x128xf32> -> vector<16x128xf32>
    %c0_51 = arith.constant 0 : index
    %c0_52 = arith.constant 0 : index
    %c0_53 = arith.constant 0 : index
    %141 = vector.load %arg14[%c0_51, %c0_52, %c0_53] : memref<1x1x128xf32, #tpu.memory_space<vmem>>, vector<1x1x128xf32>
    %142 = vector.shape_cast %141 : vector<1x1x128xf32> to vector<1x128xf32>
    %143 = vector.broadcast %142 : vector<1x128xf32> to vector<16x128xf32>
    %144 = arith.addf %140, %143 : vector<16x128xf32>
    %145 = arith.mulf %144, %144 : vector<16x128xf32>
    %146 = arith.mulf %144, %145 : vector<16x128xf32>
    %cst_54 = arith.constant 4.471500e-02 : f32
    %147 = vector.broadcast %cst_54 : f32 to vector<16x128xf32>
    %148 = arith.mulf %147, %146 : vector<16x128xf32>
    %149 = arith.addf %144, %148 : vector<16x128xf32>
    %cst_55 = arith.constant 0.797884583 : f32
    %150 = vector.broadcast %cst_55 : f32 to vector<16x128xf32>
    %151 = arith.mulf %150, %149 : vector<16x128xf32>
    %152 = math.tanh %151 : vector<16x128xf32>
    %cst_56 = arith.constant 1.000000e+00 : f32
    %153 = vector.broadcast %cst_56 : f32 to vector<16x128xf32>
    %154 = arith.addf %153, %152 : vector<16x128xf32>
    %cst_57 = arith.constant 5.000000e-01 : f32
    %155 = vector.broadcast %cst_57 : f32 to vector<16x128xf32>
    %156 = arith.mulf %155, %154 : vector<16x128xf32>
    %157 = arith.mulf %144, %156 : vector<16x128xf32>
    %158 = arith.truncf %157 : vector<16x128xf32> to vector<16x128xbf16>
    %c0_58 = arith.constant 0 : index
    %c0_59 = arith.constant 0 : index
    %c0_60 = arith.constant 0 : index
    %159 = vector.load %arg15[%c0_58, %c0_59, %c0_60] : memref<1x128x128xbf16, #tpu.memory_space<vmem>>, vector<1x128x128xbf16>
    %160 = vector.shape_cast %159 : vector<1x128x128xbf16> to vector<128x128xbf16>
    %cst_61 = arith.constant dense<0.000000e+00> : vector<16x128xf32>
    %161 = tpu.matmul %158, %160, %cst_61 {dimension_numbers = #tpu.dot_dimension_numbers<[1], [0], [0], [1], [0, 0, 1, 1], [], []>} : vector<16x128xbf16>, vector<128x128xbf16>, vector<16x128xf32> -> vector<16x128xf32>
    %c0_62 = arith.constant 0 : index
    %c0_63 = arith.constant 0 : index
    %c0_64 = arith.constant 0 : index
    %162 = vector.load %arg16[%c0_62, %c0_63, %c0_64] : memref<1x1x128xf32, #tpu.memory_space<vmem>>, vector<1x1x128xf32>
    %163 = vector.shape_cast %162 : vector<1x1x128xf32> to vector<1x128xf32>
    %164 = vector.broadcast %163 : vector<1x128xf32> to vector<16x128xf32>
    %165 = arith.addf %161, %164 : vector<16x128xf32>
    %166 = arith.addf %165, %136 : vector<16x128xf32>
    %c0_65 = arith.constant 0 : index
    %c0_66 = arith.constant 0 : index
    %c0_67 = arith.constant 0 : index
    %167 = vector.load %arg17[%c0_65, %c0_66, %c0_67] : memref<1x1x128xf32, #tpu.memory_space<vmem>>, vector<1x1x128xf32>
    %168 = vector.shape_cast %167 : vector<1x1x128xf32> to vector<1x128xf32>
    %c0_68 = arith.constant 0 : index
    %c0_69 = arith.constant 0 : index
    %c0_70 = arith.constant 0 : index
    %169 = vector.load %arg18[%c0_68, %c0_69, %c0_70] : memref<1x1x128xf32, #tpu.memory_space<vmem>>, vector<1x1x128xf32>
    %170 = vector.shape_cast %169 : vector<1x1x128xf32> to vector<1x128xf32>
    %cst_71 = arith.constant dense<0.000000e+00> : vector<16xf32>
    %171 = vector.multi_reduction <add>, %166, %cst_71 [1] : vector<16x128xf32> to vector<16xf32>
    %172 = vector.shape_cast %171 : vector<16xf32> to vector<16x1xf32>
    %cst_72 = arith.constant 3.125000e-02 : f32
    %173 = vector.broadcast %cst_72 : f32 to vector<16x1xf32>
    %174 = arith.mulf %172, %173 : vector<16x1xf32>
    %175 = tpu.iota {dimensions = array<i32: 1>} : vector<16x128xi32>
    %c32_i32_73 = arith.constant 32 : i32
    %176 = vector.broadcast %c32_i32_73 : i32 to vector<16x128xi32>
    %177 = arith.cmpi slt, %175, %176 : vector<16x128xi32>
    %178 = vector.broadcast %174 : vector<16x1xf32> to vector<16x128xf32>
    %179 = arith.subf %166, %178 : vector<16x128xf32>
    %cst_74 = arith.constant 0.000000e+00 : f32
    %180 = vector.broadcast %cst_74 : f32 to vector<16x128xf32>
    %181 = arith.select %177, %179, %180 : vector<16x128xi1>, vector<16x128xf32>
    %182 = arith.mulf %181, %181 : vector<16x128xf32>
    %cst_75 = arith.constant dense<0.000000e+00> : vector<16xf32>
    %183 = vector.multi_reduction <add>, %182, %cst_75 [1] : vector<16x128xf32> to vector<16xf32>
    %184 = vector.shape_cast %183 : vector<16xf32> to vector<16x1xf32>
    %cst_76 = arith.constant 3.125000e-02 : f32
    %185 = vector.broadcast %cst_76 : f32 to vector<16x1xf32>
    %186 = arith.mulf %184, %185 : vector<16x1xf32>
    %cst_77 = arith.constant 9.99999974E-6 : f32
    %187 = vector.broadcast %cst_77 : f32 to vector<16x1xf32>
    %188 = arith.addf %186, %187 : vector<16x1xf32>
    %189 = math.rsqrt %188 : vector<16x1xf32>
    %190 = vector.broadcast %189 : vector<16x1xf32> to vector<16x128xf32>
    %191 = arith.mulf %181, %190 : vector<16x128xf32>
    %192 = vector.broadcast %168 : vector<1x128xf32> to vector<16x128xf32>
    %193 = arith.mulf %191, %192 : vector<16x128xf32>
    %194 = vector.broadcast %170 : vector<1x128xf32> to vector<16x128xf32>
    %195 = arith.addf %193, %194 : vector<16x128xf32>
    %c0_78 = arith.constant 0 : index
    %c0_79 = arith.constant 0 : index
    %196 = vector.load %arg26[%c0_78, %c0_79] : memref<16x128xf32, #tpu.memory_space<vmem>>, vector<16x128xf32>
    tpu.vector_store %arg26[%c0_78, %c0_79], %195 {strides = array<i32>} : memref<16x128xf32, #tpu.memory_space<vmem>>, vector<16x128xf32>,
    %c1_i32 = arith.constant 1 : i32
    %197 = arith.cmpi eq, %arg0, %c1_i32 : i32
    %198 = arith.extui %197 : i1 to i32
    %c0_i32_80 = arith.constant 0 : i32
    %199 = arith.cmpi ne, %198, %c0_i32_80 : i32
    scf.if %199 {
      %c0_81 = arith.constant 0 : index
      %c0_82 = arith.constant 0 : index
      %200 = vector.load %arg26[%c0_81, %c0_82] : memref<16x128xf32, #tpu.memory_space<vmem>>, vector<16x128xf32>
      %201 = vector.extract_strided_slice %200 {offsets = [0, 0], sizes = [1, 128], strides = [1, 1]} : vector<16x128xf32> to vector<1x128xf32>
      %202 = vector.extract_strided_slice %200 {offsets = [8, 0], sizes = [1, 128], strides = [1, 1]} : vector<16x128xf32> to vector<1x128xf32>
      %203 = tpu.concatenate %201, %202 in 0 : vector<1x128xf32>, vector<1x128xf32> -> vector<2x128xf32>
      %204 = arith.truncf %203 : vector<2x128xf32> to vector<2x128xbf16>
      %c0_83 = arith.constant 0 : index
      %c0_84 = arith.constant 0 : index
      %205 = vector.load %arg19[%c0_83, %c0_84] : memref<128x128xbf16, #tpu.memory_space<vmem>>, vector<128x128xbf16>
      %cst_85 = arith.constant dense<0.000000e+00> : vector<2x128xf32>
      %206 = tpu.matmul %204, %205, %cst_85 {dimension_numbers = #tpu.dot_dimension_numbers<[1], [0], [0], [1], [0, 0, 1, 1], [], []>} : vector<2x128xbf16>, vector<128x128xbf16>, vector<2x128xf32> -> vector<2x128xf32>
      %c0_86 = arith.constant 0 : index
      %c0_87 = arith.constant 0 : index
      %207 = vector.load %arg20[%c0_86, %c0_87] : memref<1x128xf32, #tpu.memory_space<vmem>>, vector<1x128xf32>
      %208 = vector.broadcast %207 : vector<1x128xf32> to vector<2x128xf32>
      %209 = arith.addf %206, %208 : vector<2x128xf32>
      %210 = math.tanh %209 : vector<2x128xf32>
      %211 = arith.truncf %210 : vector<2x128xf32> to vector<2x128xbf16>
      %c0_88 = arith.constant 0 : index
      %c0_89 = arith.constant 0 : index
      %212 = vector.load %arg21[%c0_88, %c0_89] : memref<128x128xbf16, #tpu.memory_space<vmem>>, vector<128x128xbf16>
      %cst_90 = arith.constant dense<0.000000e+00> : vector<2x128xf32>
      %213 = tpu.matmul %211, %212, %cst_90 {dimension_numbers = #tpu.dot_dimension_numbers<[1], [0], [0], [1], [0, 0, 1, 1], [], []>} : vector<2x128xbf16>, vector<128x128xbf16>, vector<2x128xf32> -> vector<2x128xf32>
      %c0_91 = arith.constant 0 : index
      %c0_92 = arith.constant 0 : index
      %214 = vector.load %arg22[%c0_91, %c0_92] : memref<1x128xf32, #tpu.memory_space<vmem>>, vector<1x128xf32>
      %215 = vector.broadcast %214 : vector<1x128xf32> to vector<2x128xf32>
      %216 = arith.addf %213, %215 : vector<2x128xf32>
      %c0_93 = arith.constant 0 : index
      %c0_94 = arith.constant 0 : index
      %217 = vector.load %arg24[%c0_93, %c0_94] : memref<2x128xf32, #tpu.memory_space<vmem>>, vector<2x128xf32>
      tpu.vector_store %arg24[%c0_93, %c0_94], %216 {strides = array<i32>} : memref<2x128xf32, #tpu.memory_space<vmem>>, vector<2x128xf32>,
      %cst_95 = arith.constant dense<0xFF800000> : vector<2xf32>
      %218 = vector.multi_reduction <maximumf>, %216, %cst_95 [1] : vector<2x128xf32> to vector<2xf32>
      %219 = vector.shape_cast %218 : vector<2xf32> to vector<2x1xf32>
      %220 = vector.broadcast %219 : vector<2x1xf32> to vector<2x128xf32>
      %221 = arith.subf %216, %220 : vector<2x128xf32>
      %222 = math.exp %221 : vector<2x128xf32>
      %cst_96 = arith.constant dense<0.000000e+00> : vector<2xf32>
      %223 = vector.multi_reduction <add>, %222, %cst_96 [1] : vector<2x128xf32> to vector<2xf32>
      %224 = vector.shape_cast %223 : vector<2xf32> to vector<2x1xf32>
      %225 = math.log %224 : vector<2x1xf32>
      %226 = vector.broadcast %225 : vector<2x1xf32> to vector<2x128xf32>
      %227 = arith.subf %221, %226 : vector<2x128xf32>
      %c0_97 = arith.constant 0 : index
      %c0_98 = arith.constant 0 : index
      %228 = vector.load %arg23[%c0_97, %c0_98] : memref<2x128xf32, #tpu.memory_space<vmem>>, vector<2x128xf32>
      %229 = arith.mulf %228, %227 : vector<2x128xf32>
      %cst_99 = arith.constant dense<0.000000e+00> : vector<2xf32>
      %230 = vector.multi_reduction <add>, %229, %cst_99 [1] : vector<2x128xf32> to vector<2xf32>
      %231 = vector.shape_cast %230 : vector<2xf32> to vector<2x1xf32>
      %cst_100 = arith.constant 0.000000e+00 : f32
      %232 = vector.broadcast %cst_100 : f32 to vector<2x1xf32>
      %233 = arith.subf %232, %231 : vector<2x1xf32>
      %cst_101 = arith.constant dense<0.000000e+00> : vector<1xf32>
      %234 = vector.multi_reduction <add>, %233, %cst_101 [0] : vector<2x1xf32> to vector<1xf32>
      %235 = vector.shape_cast %234 : vector<1xf32> to vector<1x1xf32>
      %cst_102 = arith.constant 5.000000e-01 : f32
      %236 = vector.broadcast %cst_102 : f32 to vector<1x1xf32>
      %237 = arith.mulf %235, %236 : vector<1x1xf32>
      %c0_103 = arith.constant 0 : index
      %c0_104 = arith.constant 0 : index
      %238 = vector.load %arg25[%c0_103, %c0_104] : memref<1x1xf32, #tpu.memory_space<vmem>>, vector<1x1xf32>
      tpu.vector_store %arg25[%c0_103, %c0_104], %237 {strides = array<i32>} : memref<1x1xf32, #tpu.memory_space<vmem>>, vector<1x1xf32>,
    } else {
    }
    return
  }
  func.func @transform_0(%arg0: i32) -> (i32, i32) {
    %c0_i32 = arith.constant 0 : i32
    %c0_i32_0 = arith.constant 0 : i32
    %c0_i32_1 = arith.constant 0 : i32
    return %c0_i32, %c0_i32_0 : i32, i32
  }
  func.func @transform_1(%arg0: i32) -> (i32, i32) {
    %c0_i32 = arith.constant 0 : i32
    %c0_i32_0 = arith.constant 0 : i32
    %c0_i32_1 = arith.constant 0 : i32
    return %c0_i32, %c0_i32_0 : i32, i32
  }
  func.func @transform_2(%arg0: i32) -> (i32, i32) {
    %c0_i32 = arith.constant 0 : i32
    %c0_i32_0 = arith.constant 0 : i32
    %c0_i32_1 = arith.constant 0 : i32
    return %c0_i32, %c0_i32_0 : i32, i32
  }
  func.func @transform_3(%arg0: i32) -> (i32, i32) {
    %c0_i32 = arith.constant 0 : i32
    %c0_i32_0 = arith.constant 0 : i32
    %c0_i32_1 = arith.constant 0 : i32
    return %c0_i32, %c0_i32_0 : i32, i32
  }
  func.func @transform_4(%arg0: i32) -> (i32, i32) {
    %c0_i32 = arith.constant 0 : i32
    %c0_i32_0 = arith.constant 0 : i32
    %c0_i32_1 = arith.constant 0 : i32
    return %c0_i32, %c0_i32_0 : i32, i32
  }
  func.func @transform_5(%arg0: i32) -> (i32, i32) {
    %c0_i32 = arith.constant 0 : i32
    %c0_i32_0 = arith.constant 0 : i32
    %c0_i32_1 = arith.constant 0 : i32
    return %c0_i32, %c0_i32_0 : i32, i32
  }
  func.func @transform_6(%arg0: i32) -> (i32, i32, i32) {
    %c0_i32 = arith.constant 0 : i32
    %c0_i32_0 = arith.constant 0 : i32
    %c0_i32_1 = arith.constant 0 : i32
    return %arg0, %c0_i32, %c0_i32_0 : i32, i32, i32
  }
  func.func @transform_7(%arg0: i32) -> (i32, i32, i32) {
    %c0_i32 = arith.constant 0 : i32
    %c0_i32_0 = arith.constant 0 : i32
    %c0_i32_1 = arith.constant 0 : i32
    return %arg0, %c0_i32, %c0_i32_0 : i32, i32, i32
  }
  func.func @transform_8(%arg0: i32) -> (i32, i32, i32) {
    %c0_i32 = arith.constant 0 : i32
    %c0_i32_0 = arith.constant 0 : i32
    %c0_i32_1 = arith.constant 0 : i32
    return %arg0, %c0_i32, %c0_i32_0 : i32, i32, i32
  }
  func.func @transform_9(%arg0: i32) -> (i32, i32, i32) {
    %c0_i32 = arith.constant 0 : i32
    %c0_i32_0 = arith.constant 0 : i32
    %c0_i32_1 = arith.constant 0 : i32
    return %arg0, %c0_i32, %c0_i32_0 : i32, i32, i32
  }
  func.func @transform_10(%arg0: i32) -> (i32, i32, i32) {
    %c0_i32 = arith.constant 0 : i32
    %c0_i32_0 = arith.constant 0 : i32
    %c0_i32_1 = arith.constant 0 : i32
    return %arg0, %c0_i32, %c0_i32_0 : i32, i32, i32
  }
  func.func @transform_11(%arg0: i32) -> (i32, i32, i32) {
    %c0_i32 = arith.constant 0 : i32
    %c0_i32_0 = arith.constant 0 : i32
    %c0_i32_1 = arith.constant 0 : i32
    return %arg0, %c0_i32, %c0_i32_0 : i32, i32, i32
  }
  func.func @transform_12(%arg0: i32) -> (i32, i32, i32) {
    %c0_i32 = arith.constant 0 : i32
    %c0_i32_0 = arith.constant 0 : i32
    %c0_i32_1 = arith.constant 0 : i32
    return %arg0, %c0_i32, %c0_i32_0 : i32, i32, i32
  }
  func.func @transform_13(%arg0: i32) -> (i32, i32, i32) {
    %c0_i32 = arith.constant 0 : i32
    %c0_i32_0 = arith.constant 0 : i32
    %c0_i32_1 = arith.constant 0 : i32
    return %arg0, %c0_i32, %c0_i32_0 : i32, i32, i32
  }
  func.func @transform_14(%arg0: i32) -> (i32, i32, i32) {
    %c0_i32 = arith.constant 0 : i32
    %c0_i32_0 = arith.constant 0 : i32
    %c0_i32_1 = arith.constant 0 : i32
    return %arg0, %c0_i32, %c0_i32_0 : i32, i32, i32
  }
  func.func @transform_15(%arg0: i32) -> (i32, i32, i32) {
    %c0_i32 = arith.constant 0 : i32
    %c0_i32_0 = arith.constant 0 : i32
    %c0_i32_1 = arith.constant 0 : i32
    return %arg0, %c0_i32, %c0_i32_0 : i32, i32, i32
  }
  func.func @transform_16(%arg0: i32) -> (i32, i32, i32) {
    %c0_i32 = arith.constant 0 : i32
    %c0_i32_0 = arith.constant 0 : i32
    %c0_i32_1 = arith.constant 0 : i32
    return %arg0, %c0_i32, %c0_i32_0 : i32, i32, i32
  }
  func.func @transform_17(%arg0: i32) -> (i32, i32, i32) {
    %c0_i32 = arith.constant 0 : i32
    %c0_i32_0 = arith.constant 0 : i32
    %c0_i32_1 = arith.constant 0 : i32
    return %arg0, %c0_i32, %c0_i32_0 : i32, i32, i32
  }
  func.func @transform_18(%arg0: i32) -> (i32, i32) {
    %c0_i32 = arith.constant 0 : i32
    %c0_i32_0 = arith.constant 0 : i32
    %c0_i32_1 = arith.constant 0 : i32
    return %c0_i32, %c0_i32_0 : i32, i32
  }
  func.func @transform_19(%arg0: i32) -> (i32, i32) {
    %c0_i32 = arith.constant 0 : i32
    %c0_i32_0 = arith.constant 0 : i32
    %c0_i32_1 = arith.constant 0 : i32
    return %c0_i32, %c0_i32_0 : i32, i32
  }
  func.func @transform_20(%arg0: i32) -> (i32, i32) {
    %c0_i32 = arith.constant 0 : i32
    %c0_i32_0 = arith.constant 0 : i32
    %c0_i32_1 = arith.constant 0 : i32
    return %c0_i32, %c0_i32_0 : i32, i32
  }
  func.func @transform_21(%arg0: i32) -> (i32, i32) {
    %c0_i32 = arith.constant 0 : i32
    %c0_i32_0 = arith.constant 0 : i32
    %c0_i32_1 = arith.constant 0 : i32
    return %c0_i32, %c0_i32_0 : i32, i32
  }
  func.func @transform_22(%arg0: i32) -> (i32, i32) {
    %c0_i32 = arith.constant 0 : i32
    %c0_i32_0 = arith.constant 0 : i32
    %c0_i32_1 = arith.constant 0 : i32
    return %c0_i32, %c0_i32_0 : i32, i32
  }
  func.func @transform_23(%arg0: i32) -> (i32, i32) {
    %c0_i32 = arith.constant 0 : i32
    %c0_i32_0 = arith.constant 0 : i32
    %c0_i32_1 = arith.constant 0 : i32
    return %c0_i32, %c0_i32_0 : i32, i32
  }
  func.func @transform_24(%arg0: i32) -> (i32, i32) {
    %c0_i32 = arith.constant 0 : i32
    %c0_i32_0 = arith.constant 0 : i32
    %c0_i32_1 = arith.constant 0 : i32
    return %c0_i32, %c0_i32_0 : i32, i32
  }
}

</mosaic_0001>

<bundles_post_ra>
// kernel: eq.1
= control target key start
LH: loop header
LB: loop body
LE: loop exit
PB: predicated region body
PF: predicated region fallthrough
CT: control target
= control target key end

     0   :  { %vm7_vm0 = vcmask 64512   ;;  %vm13_vm1 = vcmask 130112   ;;  %s39_s0 = inlined_call_operand.vmem [shape: s32[2,8], index: 0, kind: input, shape index: {}]   ;;  %s40_s1 = inlined_call_operand.vmem [shape: s32[16], index: 1, kind: output, shape index: {}]  }
   0x1   :  { %v4_v0 = vld [vmem:[%s39_s0] sm:$0x3]  ;;  %s22_s0 = smov 8  }
   0x2   :  { %5 = vst [vmem:[#allocation1] sm:$0x3] %v4_v0 }
   0x9   :  { %v10_v1 = vld [vmem:[#allocation1 + $0x1] sm:$0x1]   ;;  %v6_v2 = vld [vmem:[#allocation1] sm:$0x1]  }
   0xa   :  { %11 = vrot.lane.b32.xlu0 %v10_v1, %s22_s0  ;;  %8 = vst.msk [vmem:[#allocation0] sm:$0x1] %vm7_vm0, %v6_v2  }
  0x7c   :  { %v12_v3 = vpop.permute.xlu0 %11  }
  0x7d   :  { %14 = vst.msk [vmem:[#allocation0] sm:$0x1] %vm13_vm1, %v12_v3  }
  0x84   :  { %v18_v4 = vld [vmem:[#allocation0] sm:$0x1] }
  0x85   :  { %20 = vst [vmem:[%s40_s1] sm:$0x1] %v18_v4 }

// kernel: roberta_forward.1
= control target key start
LH: loop header
LB: loop body
LE: loop exit
PB: predicated region body
PF: predicated region fallthrough
CT: control target
= control target key end

     0   :  { %s4813_s0 = inlined_call_operand.vmem [shape: f32[16,128], index: 0, kind: input, shape index: {}]   ;;  %s4814_s1 = inlined_call_operand.hbm [shape: f32[128,128], index: 1, kind: input, shape index: {}]   ;;  %s4815_s2 = inlined_call_operand.vmem [shape: f32[8,128], index: 2, kind: input, shape index: {}]   ;;  %s4816_s3 = inlined_call_operand.vmem [shape: f32[1,128], index: 3, kind: input, shape index: {}]   ;;  %s4817_s4 = inlined_call_operand.vmem [shape: f32[1,128], index: 4, kind: input, shape index: {}]   ;;  %s4818_s5 = inlined_call_operand.vmem [shape: f32[1,128], index: 5, kind: input, shape index: {}]   ;;  %s4819_s6 = inlined_call_operand.hbm [shape: bf16[2,128,768], index: 6, kind: input, shape index: {}]   ;;  %s4820_s7 = inlined_call_operand.vmem [shape: f32[2,1,768], index: 7, kind: input, shape index: {}]   ;;  %s4821_s8 = inlined_call_operand.hbm [shape: bf16[2,256,128], index: 8, kind: input, shape index: {}]   ;;  %s4822_s9 = inlined_call_operand.vmem [shape: f32[2,1,128], index: 9, kind: input, shape index: {}]   ;;  %s4823_s10 = inlined_call_operand.vmem [shape: f32[2,1,128], index: 10, kind: input, shape index: {}]   ;;  %s4824_s11 = inlined_call_operand.vmem [shape: f32[2,1,128], index: 11, kind: input, shape index: {}]   ;;  %s4825_s12 = inlined_call_operand.hbm [shape: bf16[2,128,128], index: 12, kind: input, shape index: {}]   ;;  %s4826_s13 = inlined_call_operand.vmem [shape: f32[2,1,128], index: 13, kind: input, shape index: {}]   ;;  %s4827_s14 = inlined_call_operand.hbm [shape: bf16[2,128,128], index: 14, kind: input, shape index: {}]   ;;  %s4828_s15 = inlined_call_operand.vmem [shape: f32[2,1,128], index: 15, kind: input, shape index: {}]   ;;  %s4829_s16 = inlined_call_operand.vmem [shape: f32[2,1,128], index: 16, kind: input, shape index: {}]   ;;  %s4830_s17 = inlined_call_operand.vmem [shape: f32[2,1,128], index: 17, kind: input, shape index: {}]   ;;  %s4831_s18 = inlined_call_operand.vmem [shape: bf16[128,128], index: 18, kind: input, shape index: {}]   ;;  %s4832_s19 = inlined_call_operand.vmem [shape: f32[1,128], index: 19, kind: input, shape index: {}]   ;;  %s4833_s20 = inlined_call_operand.hbm [shape: bf16[128,128], index: 20, kind: input, shape index: {}]   ;;  %s4834_s21 = inlined_call_operand.vmem [shape: f32[1,128], index: 21, kind: input, shape index: {}]   ;;  %s4835_s22 = inlined_call_operand.vmem [shape: f32[2,128], index: 22, kind: input, shape index: {}]   ;;  %s4836_s23 = inlined_call_operand.vmem [shape: f32[2,128], index: 23, kind: output, shape index: {0}]   ;;  %s4837_s24 = inlined_call_operand.hbm [shape: f32[1,1], index: 24, kind: output, shape index: {1}]  }
   0x1   :  { %4861 = sst [smem:[#allocation23_spill]] %s4813_s0 }
   0x2   :  { %4862 = sst [smem:[#allocation24_spill]] %s4814_s1 }
   0x3   :  { %4863 = sst [smem:[#allocation25_spill]] %s4815_s2 }
   0x4   :  { %4864 = sst [smem:[#allocation26_spill]] %s4816_s3 }
   0x5   :  { %4865 = sst [smem:[#allocation27_spill]] %s4817_s4 }
   0x6   :  { %4866 = sst [smem:[#allocation28_spill]] %s4818_s5 }
   0x7   :  { %4867 = sst [smem:[#allocation29_spill]] %s4819_s6 }
   0x8   :  { %4868 = sst [smem:[#allocation30_spill]] %s4820_s7 }
   0x9   :  { %4869 = sst [smem:[#allocation31_spill]] %s4821_s8 }
   0xa   :  { %4870 = sst [smem:[#allocation32_spill]] %s4824_s11 }
   0xb   :  { %4871 = sst [smem:[#allocation33_spill]] %s4825_s12 }
   0xc   :  { %4872 = sst [smem:[#allocation34_spill]] %s4826_s13 }
   0xd   :  { %4873 = sst [smem:[#allocation35_spill]] %s4827_s14 }
   0xe   :  { %4874 = sst [smem:[#allocation36_spill]] %s4828_s15 }
   0xf   :  { %4875 = sst [smem:[#allocation37_spill]] %s4829_s16 }
  0x10   :  { %4876 = sst [smem:[#allocation38_spill]] %s4830_s17 }
  0x11   :  { %4877 = sst [smem:[#allocation39_spill]] %s4831_s18 }
  0x12   :  { %4878 = sst [smem:[#allocation40_spill]] %s4832_s19 }
  0x13   :  { %4879 = sst [smem:[#allocation41_spill]] %s4833_s20 }
  0x14   :  { %4880 = sst [smem:[#allocation42_spill]] %s4834_s21 }
  0x15   :  { %4881 = sst [smem:[#allocation43_spill]] %s4835_s22 }
  0x16   :  { %4882 = sst [smem:[#allocation44_spill]] %s4836_s23 }
  0x17   :  { %4883 = sst [smem:[#allocation45_spill]] %s4837_s24 }
  0x18   :  { %30 = vsyncpa [#allocation4], 0 }
  0x19   :  { %31 = vsyncpa [#allocation7], 0 }
  0x1a   :  { %33 = vsyncpa [#allocation7 + $0x1], 0 }
  0x1b   :  { %34 = vsyncpa [#allocation10], 0 }
  0x1c   :  { %36 = vsyncpa [#allocation10 + $0x1], 0 }
  0x1d   :  { %37 = vsyncpa [#allocation13], 0 }
  0x1e   :  { %38 = vsyncpa [#allocation5], 0  ;;  %s4103_s5 = smov 0   ;;  %s4105_s26 = smov 0  }
  0x1f   :  { %s4107_s27 = smov 0   ;;  %s4109_s28 = smov 0  }
  0x20 LB: > { %4884 = sst [smem:[#allocation20_spill]] %s3954_s27  ;;  %s4124_s6 = sadd.s32 1, %s3958_s28   ;;  %s3958_s28 = sphi %s4109_s28, %s4936_s28   ;;  %s3954_s27 = sphi %s4107_s27, %s4938_s27   ;;  %s3950_s26 = sphi %s4105_s26, %s4940_s26   ;;  %s3946_s5 = sphi %s4103_s5, %s4939_s5  }
  0x21   : > { %4885 = sst [smem:[#allocation21_spill]] %s4124_s6  ;;  %s177_s2 = sadd.s32 1, %s3954_s27 }
  0x22   : > { %s174_s29 = ssub.s32 %s3958_s28, %s4124_s6  ;;  %p184_p0 = scmp.ne.s32.totalorder %s3954_s27, %s3950_s26 }
  0x23   : > { %p175_p1 = scmp.eq.s32.totalorder %s174_s29, 0  ;;  %p185_p2 = scmp.eq.s32.totalorder %s3958_s28, 0 }
  0x24   : > { %p3497_p3 = scmp.lt.s32.totalorder %s3958_s28, 2  ;;  %s4138_s30 = sand.u32 1, %s3954_s27  }
  0x25   : > { %s4134_s0 = scalar_select %p175_p1, %s3954_s27, %s177_s2  }
  0x26   : > { %p186_p4 = por %p185_p2, %p184_p0  ;;  %s3451_s3 = smul.u32 384, %s4138_s30 }
  0x27   : > { %4886 = sst [smem:[#allocation22_spill]] %s4134_s0  ;;  %s3452_s8 = smul.u32 6144, %s3958_s28 }
  0x28   : > { %p4141_p5 = pnand %p3497_p3, %p186_p4  ;;  %s4888_s6 = sld [smem:[#allocation29_spill]] }
  0x29   : > { %s704_s2 = scalar_lea.vmem [#allocation6], %s3451_s3  ;;  %s4889_s0 = sand.u32 1, %s3958_s28  }
  0x2a   : > { %s4887_s25 = scalar_select %p4141_p5, 1, 0 }
  0x2b   : > { %s711_s7 = sshll.u32 %s704_s2, 4  ;;  %s4155_s27 = scalar_lea.sflag [#allocation7], %s4889_s0  ;;  %s4151_s7 = int_to_ptr.vmem [resolvable:$true] %s711_s7 }
  0x2c   : > { %p4161_p7 = pneg %p4141_p5 }
  0x2e   : > { %s4149_s29 = scalar_lea.hbm %s4888_s6, %s3452_s8  ;;  %s3711_s3 = scalar_lea.hbm %s4888_s6, 12288 }
  0x2f   : > { %s3706_s24 = scalar_lea.hbm %s4149_s29, 6144  ;;  %p3712_p10 = scmp.lt.u32.totalorder %s4149_s29, %s4888_s6 }
  0x30   : > { %p3707_p6 = scmp.ne.s32.totalorder %s4149_s29, %s3706_s24  ;;  %p3713_p11 = scmp.lt.u32.totalorder %s3711_s3, %s3706_s24 }
  0x31   : > { %s4890_s22 = scalar_select %p4161_p7, 1, 0 }
  0x32   : > { %p3709_p8 = pnand %p4161_p7, %p3707_p6  ;;  %p3714_p12 = por %p3713_p11, %p3712_p10 }
  0x33   : > { %p3715_p13 = scmp.lt.u32.totalorder %s3706_s24, %s4149_s29 }
  0x34   : > { %p3710_p9 = pneg %p3709_p8 }
  0x35   : > { %p3716_p0 = por %p3715_p13, %p3714_p12 }
  0x37   : > { %p3717_p1 = pnand %p3716_p0, %p3710_p9 }
  0x39   : > { %3720 = shalt.err (!%p3717_p1)
}
  0x3a   : > { %s3721_s0 = scalar_lea.vmem %s4151_s7, 6144  ;;  %s3960_s8 = smov [#allocation6]  }
  0x3b   : > { %p3722_p2 = scmp.ne.s32.totalorder %s4151_s7, %s3721_s0  ;;  %s3726_s4 = sshll.u32 %s3960_s8, 4  ;;  %s3727_s4 = int_to_ptr.vmem [resolvable:$false] %s3726_s4 }
  0x3c   : > { %s3728_s1 = scalar_lea.vmem %s3727_s4, 12288  ;;  %p3729_p6 = scmp.lt.s32.totalorder %s4151_s7, %s3727_s4 }
  0x3d   : > { %p3724_p3 = pnand %p3722_p2, %p4161_p7  ;;  %p3730_p8 = scmp.lt.s32.totalorder %s3728_s1, %s3721_s0 }
  0x3f   : > { %p3725_p4 = pneg %p3724_p3  ;;  %p3731_p10 = por %p3730_p8, %p3729_p6 }
  0x41   : > { %p3732_p11 = pnand %p3731_p10, %p3725_p4 }
  0x43   : > { %3735 = shalt.err (!%p3732_p11)
}
  0x44   : > { %s3961_s24 = smov 384   ;;  %s3962_s3 = smov 24  }
  0x45   : > { %3485 = dma.hbm_to_vmem [thread:$0]  (!%p4141_p5), %s4149_s29, 6144, %s4151_s7, %s4155_s27, %s3961_s24, %s3961_s24, %s3962_s3  }
  0x46   : > { %s3031_s2 = sshll.u32 %s4138_s30, 6  ;;  %s3162_s8 = sshll.u32 %s3958_s28, 10 }
  0x47   : > { %s4891_s12 = sld [smem:[#allocation33_spill]]  ;;  %s771_s6 = scalar_lea.vmem [#allocation9], %s3031_s2 }
  0x48   : > { %s778_s23 = sshll.u32 %s771_s6, 4  ;;  %s4892_s21 = sand.u32 1, %s3958_s28   ;;  %s4196_s23 = int_to_ptr.vmem [resolvable:$true] %s778_s23 }
  0x49   : > { %s4200_s19 = scalar_lea.sflag [#allocation10], %s4892_s21 }
  0x4d   : > { %s4192_s1 = scalar_lea.hbm %s4891_s12, %s3162_s8  ;;  %s3741_s3 = scalar_lea.hbm %s4891_s12, 2048 }
  0x4e   : > { %s3736_s7 = scalar_lea.hbm %s4192_s1, 1024  ;;  %p3742_p0 = scmp.lt.u32.totalorder %s4192_s1, %s4891_s12 }
  0x4f   : > { %p3737_p9 = scmp.ne.s32.totalorder %s4192_s1, %s3736_s7  ;;  %p3743_p1 = scmp.lt.u32.totalorder %s3741_s3, %s3736_s7 }
  0x50   : > { %p3745_p3 = scmp.lt.u32.totalorder %s3736_s7, %s4192_s1 }
  0x51   : > { %p3739_p12 = pnand %p3737_p9, %p4161_p7  ;;  %p3744_p2 = por %p3743_p1, %p3742_p0 }
  0x53   : > { %p3740_p13 = pneg %p3739_p12  ;;  %p3746_p4 = por %p3745_p3, %p3744_p2 }
  0x55   : > { %p3747_p6 = pnand %p3746_p4, %p3740_p13 }
  0x57   : > { %3750 = shalt.err (!%p3747_p6)
}
  0x58   : > { %s3751_s21 = scalar_lea.vmem %s4196_s23, 1024  ;;  %s3963_s6 = smov [#allocation9]  }
  0x59   : > { %p3752_p8 = scmp.ne.s32.totalorder %s4196_s23, %s3751_s21  ;;  %s3756_s29 = sshll.u32 %s3963_s6, 4  ;;  %s3757_s29 = int_to_ptr.vmem [resolvable:$false] %s3756_s29 }
  0x5a   : > { %s3758_s24 = scalar_lea.vmem %s3757_s29, 2048  ;;  %p3759_p9 = scmp.lt.s32.totalorder %s4196_s23, %s3757_s29 }
  0x5b   : > { %p3754_p10 = pnand %p3752_p8, %p4161_p7  ;;  %p3760_p12 = scmp.lt.s32.totalorder %s3758_s24, %s3751_s21 }
  0x5d   : > { %p3755_p11 = pneg %p3754_p10  ;;  %p3761_p0 = por %p3760_p12, %p3759_p9 }
  0x5f   : > { %p3762_p1 = pnand %p3761_p0, %p3755_p11 }
  0x61   : > { %3765 = shalt.err (!%p3762_p1)
}
  0x62   : > { %s4847_s7 = smov 64   ;;  %s4849_s3 = smov 4  }
  0x63   : > { %3491 = dma.hbm_to_vmem [thread:$0]  (!%p4141_p5), %s4192_s1, 1024, %s4196_s23, %s4200_s19, %s4847_s7, %s4847_s7, %s4849_s3  }
  0x64   : > { %s4893_s14 = sld [smem:[#allocation35_spill]]  ;;  %s798_s6 = scalar_lea.vmem [#allocation11], %s3031_s2 }
  0x65   : > { %s805_s29 = sshll.u32 %s798_s6, 4  ;;  %s4239_s24 = sadd.s32 4294967295, %s3958_s28   ;;  %s4236_s29 = int_to_ptr.vmem [resolvable:$true] %s805_s29 }
  0x66   : > { %p190_p13 = scmp.ne.s32.totalorder %s3950_s26, %s3946_s5  ;;  %p4852_p2 = scmp.eq.s32.totalorder %s4239_s24, 0 }
  0x67   : > { %p3023_p3 = scmp.ge.s32.totalorder %s3958_s28, 1  ;;  %p634_p4 = scmp.lt.s32.totalorder %s3958_s28, 3 }
  0x68   : > { %p4248_p6 = por %p4852_p2, %p190_p13  ;;  %s3967_s0 = smov [#allocation12]  }
  0x69   : > { %p4253_p10 = pnand %p3023_p3, %p634_p4  ;;  %s680_s4 = sshll.u32 %s3967_s0, 4  ;;  %s4265_s4 = int_to_ptr.vmem [resolvable:$true] %s680_s4 }
  0x6a   : > { %s4232_s21 = scalar_lea.hbm %s4893_s14, %s3162_s8  ;;  %s3966_s8 = smov [#allocation3]  }
  0x6b   : > { %s4894_s23 = scalar_select %p4248_p6, 1, 0 }
  0x6c   : > { %s4895_s2 = scalar_select %p4253_p10, 1, 0 }
  0x6d   : > { %s649_s1 = sshll.u32 %s3966_s8, 4  ;;  %p3475_p11 = pneg %p4253_p10  ;;  %s650_s1 = int_to_ptr.vmem [resolvable:$true] %s649_s1 }
  0x6e   : > { %s4897_s12 = sld [smem:[#allocation24_spill]] }
  0x6f   : > { %p4261_p9 = pnand %p3475_p11, %p4852_p2 }
  0x71   : > { %p3768_p0 = pneg %p4261_p9 }
  0x74   : > { %s3766_s18 = scalar_lea.hbm %s4897_s12, 2048 }
  0x75   : > { %p3767_p12 = scmp.ne.s32.totalorder %s4897_s12, %s3766_s18  ;;  %p3773_p3 = scmp.lt.u32.totalorder %s3766_s18, %s4897_s12 }
  0x77   : > { %p3769_p1 = pnand %p3768_p0, %p3767_p12 }
  0x79   : > { %p3770_p13 = pneg %p3769_p1 }
  0x7b   : > { %p3775_p4 = pnand %p3773_p3, %p3770_p13 }
  0x7d   : > { %3778 = shalt.err (!%p3775_p4)
}
  0x7e   : > { %s3779_s0 = scalar_lea.vmem %s650_s1, 2048  ;;  %p3787_p6 = scmp.lt.s32.totalorder %s650_s1, %s650_s1 }
  0x7f   : > { %p3780_p11 = scmp.ne.s32.totalorder %s650_s1, %s3779_s0  ;;  %p3788_p10 = scmp.lt.s32.totalorder %s3779_s0, %s3779_s0 }
  0x81   : > { %p3782_p8 = pnand %p3780_p11, %p3768_p0  ;;  %p3789_p5 = por %p3788_p10, %p3787_p6 }
  0x83   : > { %p3783_p2 = pneg %p3782_p8 }
  0x85   : > { %p3790_p7 = pnand %p3789_p5, %p3783_p2 }
  0x87   : > { %3793 = shalt.err (!%p3790_p7)
}
  0x88   : > { %s3968_s17 = smov 128   ;;  %s3969_s7 = smov 8  }
  0x89   : > { %3478 = dma.hbm_to_vmem [thread:$0]  (!%p4261_p9), %s4897_s12, 2048, %s650_s1, [#allocation4], %s3968_s17, %s3968_s17, %s3969_s7  }
  0x8a   : > { %s4898_s20 = sld [smem:[#allocation41_spill]] }
  0x90   : > { %s3794_s8 = scalar_lea.hbm %s4898_s20, 1024 }
  0x91   : > { %p3795_p8 = scmp.ne.s32.totalorder %s4898_s20, %s3794_s8  ;;  %p3801_p2 = scmp.lt.u32.totalorder %s3794_s8, %s4898_s20 }
  0x93   : > { %p3797_p5 = pnand %p3795_p8, %p3768_p0 }
  0x95   : > { %p3798_p7 = pneg %p3797_p5 }
  0x97   : > { %p3803_p6 = pnand %p3801_p2, %p3798_p7 }
  0x99   : > { %3806 = shalt.err (!%p3803_p6)
}
  0x9a   : > { %s3807_s1 = scalar_lea.vmem %s4265_s4, 1024  ;;  %p3815_p13 = scmp.lt.s32.totalorder %s4265_s4, %s4265_s4 }
  0x9b   : > { %p3808_p10 = scmp.ne.s32.totalorder %s4265_s4, %s3807_s1  ;;  %p3816_p3 = scmp.lt.s32.totalorder %s3807_s1, %s3807_s1 }
  0x9d   : > { %p3810_p12 = pnand %p3808_p10, %p3768_p0  ;;  %p3817_p4 = por %p3816_p3, %p3815_p13 }
  0x9f   : > { %p3811_p1 = pneg %p3810_p12 }
  0xa1   : > { %p3818_p11 = pnand %p3817_p4, %p3811_p1 }
  0xa3   : > { %3821 = shalt.err (!%p3818_p11)
}
  0xa4   : > { %s4899_s11 = smov 4   ;;  %s4900_s13 = smov 64  }
  0xa5   : > { %3481 = dma.hbm_to_vmem [thread:$0]  (!%p4261_p9), %s4898_s20, 1024, %s4265_s4, [#allocation13], %s4900_s13, %s4900_s13, %s4899_s11  }
  0xa6   : > { %s3161_s7 = sshll.u32 %s3958_s28, 11  ;;  %s4901_s15 = sshll.u32 %s4138_s30, 7 }
  0xa7   : > { %s732_s16 = scalar_lea.vmem [#allocation8], %s4901_s15  ;;  %s4902_s0 = sld [smem:[#allocation31_spill]] }
  0xa8   : > { %s739_s18 = sshll.u32 %s732_s16, 4  ;;  %p4903_p8 = scmp.ne.s32.totalorder %s4890_s22, 0  ;;  %s4326_s18 = int_to_ptr.vmem [resolvable:$true] %s739_s18 }
  0xad   : > { %s4324_s1 = scalar_lea.hbm %s4902_s0, %s3161_s7  ;;  %s3827_s4 = scalar_lea.hbm %s4902_s0, 4096 }
  0xae   : > { %s3822_s5 = scalar_lea.hbm %s4324_s1, 2048  ;;  %p3828_p7 = scmp.lt.u32.totalorder %s4324_s1, %s4902_s0 }
  0xaf   : > { %p3823_p0 = scmp.ne.s32.totalorder %s4324_s1, %s3822_s5  ;;  %p3829_p2 = scmp.lt.u32.totalorder %s3827_s4, %s3822_s5 }
  0xb0   : > { %p3831_p10 = scmp.lt.u32.totalorder %s3822_s5, %s4324_s1 }
  0xb1   : > { %p3825_p5 = pnand %p3823_p0, %p4903_p8  ;;  %p3830_p6 = por %p3829_p2, %p3828_p7 }
  0xb3   : > { %p3826_p9 = pneg %p3825_p5  ;;  %p3832_p12 = por %p3831_p10, %p3830_p6 }
  0xb5   : > { %p3833_p1 = pnand %p3832_p12, %p3826_p9 }
  0xb7   : > { %3836 = shalt.err (!%p3833_p1)
}
  0xb8   : > { %s3837_s7 = scalar_lea.vmem %s4326_s18, 2048  ;;  %s3970_s15 = smov [#allocation8]  }
  0xb9   : > { %p3838_p13 = scmp.ne.s32.totalorder %s4326_s18, %s3837_s7  ;;  %s3842_s16 = sshll.u32 %s3970_s15, 4  ;;  %s3843_s16 = int_to_ptr.vmem [resolvable:$false] %s3842_s16 }
  0xba   : > { %s3844_s3 = scalar_lea.vmem %s3843_s16, 4096  ;;  %p3845_p11 = scmp.lt.s32.totalorder %s4326_s18, %s3843_s16 }
  0xbb   : > { %p3840_p3 = pnand %p3838_p13, %p4903_p8  ;;  %p3846_p0 = scmp.lt.s32.totalorder %s3844_s3, %s3837_s7 }
  0xbd   : > { %p3841_p4 = pneg %p3840_p3  ;;  %p3847_p5 = por %p3846_p0, %p3845_p11 }
  0xbf   : > { %p3848_p7 = pnand %p3847_p5, %p3841_p4 }
  0xc1   : > { %3851 = shalt.err (!%p3848_p7)
}
  0xc2   : > { %p4904_p9 = scmp.ne.s32.totalorder %s4887_s25, 0  ;;  %s3852_s8 = scalar_lea.hbm %s4232_s21, 1024 }
  0xc3   : > { %p3853_p2 = scmp.ne.s32.totalorder %s4232_s21, %s3852_s8  ;;  %s3857_s30 = scalar_lea.hbm %s4893_s14, 2048 }
  0xc4   : > { %3488 = dma.hbm_to_vmem [thread:$0]  (!%p4904_p9), %s4324_s1, 2048, %s4326_s18, %s4155_s27, %s4900_s13, %s4900_s13, %s4899_s11  }
  0xc5   : > { %p3855_p6 = pnand %p3853_p2, %p4903_p8  ;;  %p3858_p12 = scmp.lt.u32.totalorder %s4232_s21, %s4893_s14 }
  0xc6   : > { %p3859_p1 = scmp.lt.u32.totalorder %s3857_s30, %s3852_s8  ;;  %p3861_p3 = scmp.lt.u32.totalorder %s3852_s8, %s4232_s21 }
  0xc7   : > { %p3856_p10 = pneg %p3855_p6 }
  0xc8   : > { %p3860_p13 = por %p3859_p1, %p3858_p12 }
  0xca   : > { %p3862_p4 = por %p3861_p3, %p3860_p13 }
  0xcc   : > { %p3863_p11 = pnand %p3862_p4, %p3856_p10 }
  0xce   : > { %3866 = shalt.err (!%p3863_p11)
}
  0xcf   : > { %s3867_s27 = scalar_lea.vmem %s4236_s29, 1024  ;;  %s3971_s18 = smov [#allocation11]  }
  0xd0   : > { %p3868_p0 = scmp.ne.s32.totalorder %s4236_s29, %s3867_s27  ;;  %s3872_s1 = sshll.u32 %s3971_s18, 4  ;;  %s3873_s1 = int_to_ptr.vmem [resolvable:$false] %s3872_s1 }
  0xd1   : > { %s3874_s17 = scalar_lea.vmem %s3873_s1, 2048  ;;  %p3875_p2 = scmp.lt.s32.totalorder %s4236_s29, %s3873_s1 }
  0xd2   : > { %p3870_p5 = pnand %p3868_p0, %p4903_p8  ;;  %p3876_p6 = scmp.lt.s32.totalorder %s3874_s17, %s3867_s27 }
  0xd4   : > { %p3871_p7 = pneg %p3870_p5  ;;  %p3877_p12 = por %p3876_p6, %p3875_p2 }
  0xd6   : > { %p3878_p1 = pnand %p3877_p12, %p3871_p7 }
  0xd8   : > { %3881 = shalt.err (!%p3878_p1)
}
  0xd9   : > { %3494 = dma.hbm_to_vmem [thread:$0]  (!%p4904_p9), %s4232_s21, 1024, %s4236_s29, %s4200_s19, %s4900_s13, %s4900_s13, %s4899_s11  }
  0xda   : > { %p4905_p8 = scmp.ne.s32.totalorder %s4895_s2, 0 }
  0xdb   : > { %p4906_p10 = scmp.eq.s32.totalorder (!%p4905_p8), %s4239_s24, 0 }
  0xdc   : > { %835 = sbr.rel (%p4905_p8) target bundleno = 5706 (0x164a), region = 112 }
  0xe3   : > { %3925 = dma.done.wait (%p4906_p10), [#allocation4], 2048   ;;  %p4907_p13 = pmov %p4906_p10 }
  0xe4   : > { %s841_s22 = sand.u32 1, %s4239_s24   ;;  %s843_s25 = sand.u32 1, %s3950_s26  }
  0xe5   : > { %3927 = vsyncadd (%p4907_p13), [#allocation4], 4294965248  ;;  %s3453_s7 = smul.u32 384, %s843_s25  ;;  %s842_s15 = scalar_lea.sflag [#allocation7], %s841_s22 }
  0xe6   : > { %p4908_p3 = scmp.ne.s32.totalorder %s4894_s23, 0 }
  0xe7   : > { %s4386_s16 = scalar_lea.vmem [#allocation6], %s3453_s7 }
  0xe8   : > { %3929 = dma.done.wait (%p4908_p3), %s842_s15, 8192  }
  0xe9   : > { %3931 = vsyncadd (%p4908_p3), %s842_s15, 4294959104  ;;  %s3039_s19 = sshll.u32 %s843_s25, 7  ;;  %s3040_s21 = sshll.u32 %s843_s25, 6 }
  0xea   : > { %s4392_s29 = scalar_lea.vmem [#allocation8], %s3039_s19  ;;  %s860_s2 = scalar_lea.sflag [#allocation10], %s841_s22 }
  0xeb   : > { %s4394_s11 = scalar_lea.vmem [#allocation9], %s3040_s21 }
  0xec   : > { %3933 = dma.done.wait (%p4908_p3), %s860_s2, 2048  }
  0xed   : > { %3935 = vsyncadd (%p4908_p3), %s860_s2, 4294965248  ;;  %s4400_s13 = scalar_lea.vmem [#allocation11], %s3040_s21  ;;  %p4909_p9 = pmov %p4906_p10 }
  0xef   : > { %3937 = dma.done.wait (%p4909_p9), [#allocation13], 1024   ;;  %p4910_p4 = pmov %p4909_p9 }
  0xf0   : > { %p976_p11 = scmp.lt.s32.totalorder %s4239_s24, 1  ;;  %s4911_s1 = sld [smem:[#allocation32_spill]] }
  0xf1   : > { %3939 = vsyncadd (%p4910_p4), [#allocation13], 4294966272  ;;  %s4912_s7 = sld [smem:[#allocation30_spill]]  ;;  %s4913_s2 = sld [smem:[#allocation34_spill]] }
  0xf2   : > { %s4408_s3 = scalar_select %p976_p11, %s4239_s24, 1 }
  0xf3   : > { %s4914_s5 = sld [smem:[#allocation36_spill]]  ;;  %s4915_s4 = sld [smem:[#allocation37_spill]] }
  0xf4   : > { %s3454_s23 = smul.u32 6, %s4408_s3  ;;  %s4916_s18 = sld [smem:[#allocation38_spill]] }
  0xf5   : > { %p4917_p0 = scmp.ne.s32.totalorder %s4239_s24, 0 }
  0xf6   : > { %s988_s17 = scalar_lea.vmem %s4911_s1, %s4408_s3  ;;  %v1008_v0 = vld [vmem:[#allocation3] sm:$0xff] (!%p4917_p0)  ;;  %v1009_v1 = vld [vmem:[#allocation3 + $0x8] sm:$0xff] (!%p4917_p0)  ;;  %v1010_v2 = vld [vmem:[#allocation3 + $0x10] sm:$0xff] (!%p4917_p0)  ;;  %s4919_s19 = sld [smem:[#allocation25_spill]] (!%p4917_p0)  ;;  %v1117_v34 = vlaneseq (!%p4917_p0) }
  0xf7   : > { %s4426_s15 = scalar_lea.vmem %s4912_s7, %s3454_s23  ;;  %s991_s0 = scalar_lea.vmem %s4913_s2, %s4408_s3  ;;  %v3419_v3 = vpack.c.bf16 (!%p4917_p0), %v1009_v1, %v1008_v0  ;;  %v1011_v4 = vld [vmem:[#allocation3 + $0x18] sm:$0xff] (!%p4917_p0)  ;;  %v1012_v6 = vld [vmem:[#allocation3 + $0x20] sm:$0xff] (!%p4917_p0)  ;;  %v1013_v7 = vld [vmem:[#allocation3 + $0x28] sm:$0xff] (!%p4917_p0) }
  0xf8   : > { %1005 = sbr.rel (%p4917_p0) target bundleno = 815 (0x32f), region = 140  ;;  %v3423_v5 = vpack.c.bf16 (!%p4917_p0), %v1011_v4, %v1010_v2  ;;  %v3427_v8 = vpack.c.bf16 (!%p4917_p0), %v1013_v7, %v1012_v6  ;;  %s4918_s23 = sld [smem:[#allocation23_spill]] (!%p4917_p0)  ;;  %v1014_v10 = vld [vmem:[#allocation3 + $0x30] sm:$0xff] (!%p4917_p0)  ;;  %v1015_v11 = vld [vmem:[#allocation3 + $0x38] sm:$0xff] (!%p4917_p0)  ;;  %v1016_v13 = vld [vmem:[#allocation3 + $0x40] sm:$0xff] (!%p4917_p0)  ;;  %v1118_v35 = vand.u32 (!%p4917_p0), 127, %v1117_v34 }
  0xf9   : > { %s994_s28 = scalar_lea.vmem %s4914_s5, %s4408_s3  ;;  %s997_s6 = scalar_lea.vmem %s4915_s4, %s4408_s3  ;;  %3420 = vmatprep.subr.bf16.mxu0 (!%p4917_p0), %v3419_v3  ;;  %v3431_v12 = vpack.c.bf16 (!%p4917_p0), %v1015_v11, %v1014_v10  ;;  %v1017_v14 = vld [vmem:[#allocation3 + $0x48] sm:$0xff] (!%p4917_p0)  ;;  %v1018_v16 = vld [vmem:[#allocation3 + $0x50] sm:$0xff] (!%p4917_p0)  ;;  %v1019_v17 = vld [vmem:[#allocation3 + $0x58] sm:$0xff] (!%p4917_p0) }
  0xfa   : > { %s1000_s1 = scalar_lea.vmem %s4916_s18, %s4408_s3  ;;  %3422 = vmatpush3.bf16.msra.mxu0 (!%p4917_p0), %v3419_v3  ;;  %v3435_v15 = vpack.c.bf16 (!%p4917_p0), %v1017_v14, %v1016_v13  ;;  %v3439_v18 = vpack.c.bf16 (!%p4917_p0), %v1019_v17, %v1018_v16  ;;  %v1020_v19 = vld [vmem:[#allocation3 + $0x60] sm:$0xff] (!%p4917_p0)  ;;  %v1021_v20 = vld [vmem:[#allocation3 + $0x68] sm:$0xff] (!%p4917_p0)  ;;  %v1022_v22 = vld [vmem:[#allocation3 + $0x70] sm:$0xff] (!%p4917_p0)  ;;  %s4920_s8 = sld [smem:[#allocation26_spill]] (!%p4917_p0)  ;;  %vm1119_vm0 = vcmp.lt.s32.totalorder (!%p4917_p0), %v1118_v35, 32 }
  0xfb   : > { %3424 = vmatprep.subr.bf16.mxu0 (!%p4917_p0), %v3423_v5  ;;  %v3443_v21 = vpack.c.bf16 (!%p4917_p0), %v1021_v20, %v1020_v19  ;;  %v1023_v23 = vld [vmem:[#allocation3 + $0x78] sm:$0xff] (!%p4917_p0)  ;;  %s4921_s4 = sld [smem:[#allocation27_spill]] (!%p4917_p0)  ;;  %s4922_s12 = sld [smem:[#allocation28_spill]] (!%p4917_p0) }
  0xfc   : > { %v3447_v24 = vpack.c.bf16 (!%p4917_p0), %v1023_v23, %v1022_v22  ;;  %v1024_v26 = vld [vmem:[%s4919_s19] sm:$0xff] (!%p4917_p0) }
  0xfe   : > { %v1006_v9 = vld [vmem:[%s4918_s23] sm:$0xff] (!%p4917_p0)  ;;  %3426 = vmatpush3.bf16.msra.mxu0 (!%p4917_p0), %v3423_v5  ;;  %v1007_v25 = vld [vmem:[%s4918_s23 + $0x8] sm:$0xff] (!%p4917_p0) }
  0xff   : > { %3288 = vmatprep.mubr.f32.mxu0 %v1006_v9  ;;  %3428 = vmatprep.subr.bf16.mxu0 %v3427_v8 }
 0x100   : > { %v3044_v29 = vld [vmem:[%s4920_s8] ss:$0 sm:$0xff] }
 0x101   : > { %v3045_v53 = vld [vmem:[%s4921_s4] ss:$0 sm:$0xff] }
 0x102   : > { %3430 = vmatpush3.bf16.msra.mxu0 %v3427_v8  ;;  %v3046_v55 = vld [vmem:[%s4922_s12] ss:$0 sm:$0xff] }
 0x103   : > { %3432 = vmatprep.subr.bf16.mxu0 %v3431_v12 }
 0x106   : > { %3434 = vmatpush3.bf16.msra.mxu0 %v3431_v12 }
 0x107   : > { %3436 = vmatprep.subr.bf16.mxu0 %v3435_v15 }
 0x10a   : > { %3438 = vmatpush3.bf16.msra.mxu0 %v3435_v15 }
 0x10b   : > { %3440 = vmatprep.subr.bf16.mxu0 %v3439_v18 }
 0x10e   : > { %3442 = vmatpush3.bf16.msra.mxu0 %v3439_v18 }
 0x10f   : > { %3444 = vmatprep.subr.bf16.mxu0 %v3443_v21 }
 0x112   : > { %3446 = vmatpush3.bf16.msra.mxu0 %v3443_v21 }
 0x113   : > { %3448 = vmatprep.subr.bf16.mxu0 %v3447_v24 }
 0x116   : > { %3450 = vmatpush3.bf16.msra.mxu0 %v3447_v24 }
 0x119   : > { %3289 = vmatmul.mubr.f32.vlgmr.msra.gmra.mrb[0].mxu0 %v1007_v25 }
 0x1ec   : > { %v3290_v27 = vpop.f32.mrb[0].mxu0 }
 0x1ed   : > { %v1091_v28 = vpop.f32.mrb[1].mxu0  ;;  %v1097_v31 = vadd.f32 %v3290_v27, %v1024_v26 }
 0x1ee   : > { %v1092_v30 = vadd.f32 %v1091_v28, %v1024_v26 }
 0x1ef   : > { %v1108_v33 = vadd.f32 %v3044_v29, %v1097_v31 }
 0x1f0   : > { %v1107_v32 = vadd.f32 %v3044_v29, %v1092_v30 }
 0x1f2   : > { %1111 = vadd.xlane.f32.xlu0 %v1107_v32 }
 0x1f6   : > { %1113 = vadd.xlane.f32.xlu0 %v1108_v33 }
 0x27f   : > { %v1112_v36 = vpop.xlane.xlu0 %1111 }
 0x280   : > { %v1115_v37 = vmul.f32 0.03125, %v1112_v36 }
 0x282   : > { %v1120_v38 = vsub.f32 %v1107_v32, %v1115_v37 }
 0x283   : > { %v1114_v39 = vpop.xlane.xlu0 %1113 }
 0x284   : > { %v1116_v40 = vmul.f32 0.03125, %v1114_v39  ;;  %v1122_v41 = vsel %vm1119_vm0, %v1120_v38, 0.0 }
 0x285   : > { %v1124_v42 = vmul.f32 %v1122_v41, %v1122_v41 }
 0x286   : > { %v1121_v43 = vsub.f32 %v1108_v33, %v1116_v40 }
 0x287   : > { %1126 = vadd.xlane.f32.xlu1 %v1124_v42 }
 0x288   : > { %v1123_v44 = vsel %vm1119_vm0, %v1121_v43, 0.0 }
 0x289   : > { %v1125_v45 = vmul.f32 %v1123_v44, %v1123_v44 }
 0x28b   : > { %1128 = vadd.xlane.f32.xlu1 %v1125_v45 }
 0x314   : > { %v1127_v46 = vpop.xlane.xlu1 %1126 }
 0x315   : > { %v1130_v47 = vmul.f32 0.03125, %v1127_v46 }
 0x317   : > { %v1132_v48 = vadd.f32 1e-05, %v1130_v47 }
 0x318   : > { %v1129_v49 = vpop.xlane.xlu1 %1128 }
 0x319   : > { %3548 = vrsqrt.f32 %v1132_v48  ;;  %v1131_v50 = vmul.f32 0.03125, %v1129_v49 }
 0x31b   : > { %v1133_v51 = vadd.f32 1e-05, %v1131_v50 }
 0x31d   : > { %3550 = vrsqrt.f32 %v1133_v51 }
 0x323   : > { %v3549_v52 = vpop.eup %3548 }
 0x324   : > { %v1136_v54 = vmul.f32 %v3549_v52, %v1122_v41 }
 0x326   : > { %v1144_v56 = vmul.f32 %v3045_v53, %v1136_v54 }
 0x327   : > { %v3551_v57 = vpop.eup %3550 }
 0x328   : > { %v1152_v58 = vadd.f32 %v3046_v55, %v1144_v56  ;;  %v1137_v59 = vmul.f32 %v3551_v57, %v1123_v44 }
 0x32a   : > { %1154 = vst [vmem:[#allocation2] sm:$0xff] %v1152_v58  ;;  %v1145_v60 = vmul.f32 %v3045_v53, %v1137_v59 }
 0x32c   : > { %v1153_v61 = vadd.f32 %v3046_v55, %v1145_v60 }
 0x32e   : > { %1155 = vst [vmem:[#allocation2 + $0x8] sm:$0xff] %v1153_v61 }
 0x32f PF: > { %v3552_v62 = vld [vmem:[%s4386_s16 + $0x4] ss:$24 sps:$4 sm:$0xff]   ;;  %v3554_v63 = vld [vmem:[%s4386_s16] ss:$24 sps:$4 sm:$0xff]   ;;  %v3972_v0 = vmov 0   ;;  %v3973_v34 = vmov 0.0   ;;  %v1209_v35 = vlaneseq  ;;  %s4924_s22 = scalar_lea.vmem %s4823_s10, %s4408_s3 }
 0x330   : > { %1511 = vmatprep.mubr.bf16.mxu0 %v3972_v0  ;;  %1554 = vmatprep.mubr.bf16.mxu1 %v3972_v0  ;;  %v3555_v1 = vld [vmem:[%s4386_s16 + $0x34] ss:$24 sps:$4 sm:$0xff]   ;;  %v3557_v2 = vld [vmem:[%s4386_s16 + $0x30] ss:$24 sps:$4 sm:$0xff]   ;;  %v3558_v3 = vld [vmem:[%s4386_s16 + $0x64] ss:$24 sps:$4 sm:$0xff]  }
 0x331   : > { %1479 = vmatprep.subr.bf16.mxu0 %v3552_v62  ;;  %v3560_v4 = vld [vmem:[%s4386_s16 + $0x60] ss:$24 sps:$4 sm:$0xff]   ;;  %v3561_v5 = vld [vmem:[%s4386_s16 + $0x94] ss:$24 sps:$4 sm:$0xff]   ;;  %v3563_v6 = vld [vmem:[%s4386_s16 + $0x90] ss:$24 sps:$4 sm:$0xff]  }
 0x332   : > { %1480 = vmatpush1.bf16.msra.mxu0 %v3554_v63  ;;  %v3564_v7 = vld [vmem:[%s4386_s16 + $0xc4] ss:$24 sps:$4 sm:$0xff]   ;;  %v3578_v9 = vld [vmem:[%s4386_s16 + $0x8] ss:$24 sps:$4 sm:$0xff]   ;;  %v3581_v12 = vld [vmem:[%s4386_s16 + $0x38] ss:$24 sps:$4 sm:$0xff]  }
 0x333   : > { %1481 = vmatprep.subr.bf16.mxu0 %v3555_v1  ;;  %v3576_v8 = vld [vmem:[%s4386_s16 + $0xc] ss:$24 sps:$4 sm:$0xff]   ;;  %v3579_v10 = vld [vmem:[%s4386_s16 + $0x3c] ss:$24 sps:$4 sm:$0xff]   ;;  %v3566_v11 = vld [vmem:[%s4386_s16 + $0xc0] ss:$24 sps:$4 sm:$0xff]  }
 0x334   : > { %1522 = vmatprep.subr.bf16.mxu1 %v3576_v8  ;;  %v3567_v13 = vld [vmem:[%s4386_s16 + $0xf4] ss:$24 sps:$4 sm:$0xff]   ;;  %v3569_v15 = vld [vmem:[%s4386_s16 + $0xf0] ss:$24 sps:$4 sm:$0xff]   ;;  %v3570_v17 = vld [vmem:[%s4386_s16 + $0x124] ss:$24 sps:$4 sm:$0xff]  }
 0x335   : > { %1523 = vmatpush1.bf16.msra.mxu1 %v3578_v9  ;;  %v3582_v14 = vld [vmem:[%s4386_s16 + $0x6c] ss:$24 sps:$4 sm:$0xff]   ;;  %v3584_v16 = vld [vmem:[%s4386_s16 + $0x68] ss:$24 sps:$4 sm:$0xff]   ;;  %v3585_v18 = vld [vmem:[%s4386_s16 + $0x9c] ss:$24 sps:$4 sm:$0xff]  }
 0x336   : > { %1482 = vmatpush1.bf16.msra.mxu0 %v3557_v2  ;;  %1524 = vmatprep.subr.bf16.mxu1 %v3579_v10  ;;  %v3572_v19 = vld [vmem:[%s4386_s16 + $0x120] ss:$24 sps:$4 sm:$0xff]   ;;  %v3573_v21 = vld [vmem:[%s4386_s16 + $0x154] ss:$24 sps:$4 sm:$0xff]   ;;  %v3575_v23 = vld [vmem:[%s4386_s16 + $0x150] ss:$24 sps:$4 sm:$0xff]  }
 0x337   : > { %1483 = vmatprep.subr.bf16.mxu0 %v3558_v3  ;;  %v3587_v20 = vld [vmem:[%s4386_s16 + $0x98] ss:$24 sps:$4 sm:$0xff]   ;;  %v3588_v22 = vld [vmem:[%s4386_s16 + $0xcc] ss:$24 sps:$4 sm:$0xff]   ;;  %v3590_v26 = vld [vmem:[%s4386_s16 + $0xc8] ss:$24 sps:$4 sm:$0xff]  }
 0x338   : > { %v4491_v24 = vld [vmem:[#allocation2] sm:$0xff]  ;;  %v4493_v25 = vld [vmem:[#allocation2 + $0x8] sm:$0xff]  ;;  %v3594_v30 = vld [vmem:[%s4386_s16 + $0x12c] ss:$24 sps:$4 sm:$0xff]   ;;  %vm3974_vm1 = vmmov 0   ;;  %v4513_v36 = vshrl.u32 %v1209_v35, 7 }
 0x339   : > { %1525 = vmatpush1.bf16.msra.mxu1 %v3581_v12  ;;  %v3591_v27 = vld [vmem:[%s4386_s16 + $0xfc] ss:$24 sps:$4 sm:$0xff]   ;;  %v3593_v28 = vld [vmem:[%s4386_s16 + $0xf8] ss:$24 sps:$4 sm:$0xff]   ;;  %v4500_v29 = vpack.c.bf16 %v4493_v25, %v4491_v24  ;;  %v3596_v31 = vld [vmem:[%s4386_s16 + $0x128] ss:$24 sps:$4 sm:$0xff]  }
 0x33a   : > { %1484 = vmatpush1.bf16.msra.mxu0 %v3560_v4  ;;  %1526 = vmatprep.subr.bf16.mxu1 %v3582_v14  ;;  %v3597_v32 = vld [vmem:[%s4386_s16 + $0x15c] ss:$24 sps:$4 sm:$0xff]   ;;  %v3599_v33 = vld [vmem:[%s4386_s16 + $0x158] ss:$24 sps:$4 sm:$0xff]   ;;  %v1215_v37 = vsub.s32 1, %v4513_v36  ;;  %v1211_v39 = vsub.s32 0, %v4513_v36 }
 0x33b   : > { %1485 = vmatprep.subr.bf16.mxu0 %v3561_v5  ;;  %v4517_v38 = vld [vmem:[%s4426_s15] sm:$0x3f]  ;;  %v1219_v50 = vsub.s32 2, %v4513_v36  ;;  %v1223_v52 = vsub.s32 3, %v4513_v36  ;;  %vm1668_vm2 = vcmask 1043456   ;;  %vm1652_vm3 = vcmask 64512   ;;  %s4923_s15 = scalar_lea.vmem %s4822_s9, %s4408_s3 }
 0x33c   : > { %v1216_v40 = vrot.slane %v4517_v38, %v1215_v37  ;;  %v1212_v42 = vrot.slane %v4517_v38, %v1211_v39  ;;  %v3600_v1 = vld [vmem:[%s4386_s16 + $0x10] ss:$24 sps:$4 sm:$0xff]   ;;  %v3602_v2 = vld [vmem:[%s4386_s16 + $0x14] ss:$24 sps:$4 sm:$0xff]   ;;  %v3605_v3 = vld [vmem:[%s4386_s16 + $0x44] ss:$24 sps:$4 sm:$0xff]  }
 0x33d   : > { %1527 = vmatpush1.bf16.msra.mxu1 %v3584_v16  ;;  %v1220_v53 = vrot.slane %v4517_v38, %v1219_v50  ;;  %v4531_v56 = vrot.slane %v4517_v38, %v1223_v52  ;;  %v3603_v4 = vld [vmem:[%s4386_s16 + $0x40] ss:$24 sps:$4 sm:$0xff]   ;;  %v3608_v5 = vld [vmem:[%s4386_s16 + $0x74] ss:$24 sps:$4 sm:$0xff]   ;;  %v3612_v10 = vld [vmem:[%s4386_s16 + $0xd0] ss:$24 sps:$4 sm:$0xff]  }
 0x33e   : > { %1486 = vmatpush1.bf16.msra.mxu0 %v3563_v6  ;;  %1528 = vmatprep.subr.bf16.mxu1 %v3585_v18  ;;  %v3606_v6 = vld [vmem:[%s4386_s16 + $0x70] ss:$24 sps:$4 sm:$0xff]   ;;  %v3609_v8 = vld [vmem:[%s4386_s16 + $0xa0] ss:$24 sps:$4 sm:$0xff]   ;;  %v3614_v9 = vld [vmem:[%s4386_s16 + $0xd4] ss:$24 sps:$4 sm:$0xff]  }
 0x33f   : > { %1487 = vmatprep.subr.bf16.mxu0 %v3564_v7  ;;  %v3611_v7 = vld [vmem:[%s4386_s16 + $0xa4] ss:$24 sps:$4 sm:$0xff]   ;;  %v3615_v12 = vld [vmem:[%s4386_s16 + $0x100] ss:$24 sps:$4 sm:$0xff]   ;;  %v3618_v14 = vld [vmem:[%s4386_s16 + $0x130] ss:$24 sps:$4 sm:$0xff]  }
 0x340   : > { %v3621_v16 = vld [vmem:[%s4386_s16 + $0x160] ss:$24 sps:$4 sm:$0xff]   ;;  %p3138_p5 = scmp.ne.s32.totalorder %s4239_s24, 1 }
 0x341   : > { %1529 = vmatpush1.bf16.msra.mxu1 %v3587_v20  ;;  %vm3976_vm5 = vmmov (!%p3138_p5), 0   ;;  %vm2542_vm6 = vcmask (!%p3138_p5), 1040384   ;;  %s4931_s2 = sld [smem:[#allocation40_spill]] (!%p3138_p5)  ;;  %s4932_s5 = sld [smem:[#allocation42_spill]] (!%p3138_p5)  ;;  %vm2770_vm7 = vcmask (!%p3138_p5), 1041408   ;;  %vm2797_vm8 = vcmask (!%p3138_p5), 0  }
 0x342   : > { %1488 = vmatpush1.bf16.msra.mxu0 %v3566_v11  ;;  %1530 = vmatprep.subr.bf16.mxu1 %v3588_v22  ;;  %v3617_v11 = vld [vmem:[%s4386_s16 + $0x104] ss:$24 sps:$4 sm:$0xff]   ;;  %s4933_s27 = sld [smem:[#allocation44_spill]] (!%p3138_p5)  ;;  %s4934_s3 = sld [smem:[#allocation43_spill]] (!%p3138_p5) }
 0x343   : > { %1489 = vmatprep.subr.bf16.mxu0 %v3567_v13  ;;  %v3620_v13 = vld [vmem:[%s4386_s16 + $0x134] ss:$24 sps:$4 sm:$0xff]  }
 0x345   : > { %1531 = vmatpush1.bf16.msra.mxu1 %v3590_v26 }
 0x346   : > { %1490 = vmatpush1.bf16.msra.mxu0 %v3569_v15  ;;  %1532 = vmatprep.subr.bf16.mxu1 %v3591_v27  ;;  %v3623_v15 = vld [vmem:[%s4386_s16 + $0x164] ss:$24 sps:$4 sm:$0xff]  }
 0x347   : > { %1491 = vmatprep.subr.bf16.mxu0 %v3570_v17 }
 0x349   : > { %1533 = vmatpush1.bf16.msra.mxu1 %v3593_v28 }
 0x34a   : > { %1492 = vmatpush1.bf16.msra.mxu0 %v3572_v19  ;;  %1534 = vmatprep.subr.bf16.mxu1 %v3594_v30 }
 0x34b   : > { %1493 = vmatprep.subr.bf16.mxu0 %v3573_v21 }
 0x34d   : > { %1535 = vmatpush1.bf16.msra.mxu1 %v3596_v31  ;;  %v1227_v31 = vsub.s32 4, %v4513_v36 }
 0x34e   : > { %1494 = vmatpush1.bf16.msra.mxu0 %v3575_v23  ;;  %1536 = vmatprep.subr.bf16.mxu1 %v3597_v32  ;;  %v1231_v32 = vsub.s32 5, %v4513_v36 }
 0x34f   : > { %1565 = vmatprep.subr.bf16.mxu0 %v3602_v2 }
 0x350   : > { %v1232_v39 = vrot.slane %v4517_v38, %v1231_v32 }
 0x351   : > { %1512 = vmatmul.mubr.bf16.vlgmr.msra.gmra.mrb[0].mxu0 %v4500_v29  ;;  %1537 = vmatpush1.bf16.msra.mxu1 %v3599_v33  ;;  %v1228_v33 = vrot.slane %v4517_v38, %v1227_v31 }
 0x352   : > { %1597 = vmatprep.mubr.bf16.mxu0 %v3972_v0  ;;  %3291 = vmatprep.subr.bf16.mxu1 %v3973_v34 }
 0x353   : > { %1566 = vmatpush1.bf16.msra.mxu0 %v3600_v1 }
 0x354   : > { %1555 = vmatmul.mubr.bf16.vlgmr.msra.gmra.mrb[0].mxu1 %v4500_v29  ;;  %1567 = vmatprep.subr.bf16.mxu0 %v3605_v3 }
 0x355   : > { %3293 = vmatprep.mubr.msk.bf16.mxu1 %vm3974_vm1, %v3973_v34 }
 0x357   : > { %1568 = vmatpush1.bf16.msra.mxu0 %v3603_v4 }
 0x358   : > { %1569 = vmatprep.subr.bf16.mxu0 %v3608_v5 }
 0x35b   : > { %1570 = vmatpush1.bf16.msra.mxu0 %v3606_v6 }
 0x35c   : > { %1571 = vmatprep.subr.bf16.mxu0 %v3611_v7 }
 0x35f   : > { %1572 = vmatpush1.bf16.msra.mxu0 %v3609_v8 }
 0x360   : > { %1573 = vmatprep.subr.bf16.mxu0 %v3614_v9 }
 0x363   : > { %1574 = vmatpush1.bf16.msra.mxu0 %v3612_v10 }
 0x364   : > { %1575 = vmatprep.subr.bf16.mxu0 %v3617_v11 }
 0x367   : > { %1576 = vmatpush1.bf16.msra.mxu0 %v3615_v12 }
 0x368   : > { %1577 = vmatprep.subr.bf16.mxu0 %v3620_v13 }
 0x36b   : > { %1578 = vmatpush1.bf16.msra.mxu0 %v3618_v14 }
 0x36c   : > { %1579 = vmatprep.subr.bf16.mxu0 %v3623_v15 }
 0x36f   : > { %1580 = vmatpush1.bf16.msra.mxu0 %v3621_v16 }
 0x372   : > { %1598 = vmatmul.mubr.bf16.vlgmr.msra.gmra.mrb[4].mxu0 %v4500_v29 }
 0x424   : > { %v1513_v41 = vpop.f32.mrb[0].mxu0 }
 0x425   : > { %v1515_v43 = vpop.f32.mrb[1].mxu0  ;;  %v1514_v51 = vadd.f32 %v1513_v41, %v1212_v42 }
 0x426   : > { %v1516_v44 = vadd.f32 %v1515_v43, %v1216_v40  ;;  %v1517_v45 = vpop.f32.mrb[2].mxu0 }
 0x427   : > { %v4522_v46 = vadd.f32 %v1517_v45, %v1212_v42  ;;  %v1519_v47 = vpop.f32.mrb[3].mxu0  ;;  %v1608_v54 = vpack.c.bf16 %v1514_v51, %v1514_v51  ;;  %v1556_v55 = vpop.f32.mrb[0].mxu1 }
 0x428   : > { %v1609_v48 = vpack.c.bf16 %v1516_v44, %v1516_v44  ;;  %v4524_v49 = vadd.f32 %v1519_v47, %v1216_v40  ;;  %v1557_v57 = vadd.f32 %v1556_v55, %v1220_v53  ;;  %v4533_v58 = vpop.f32.mrb[1].mxu1 }
 0x429   : > { %v1560_v59 = vpop.f32.mrb[2].mxu1  ;;  %v1559_v36 = vadd.f32 %v4533_v58, %v4531_v56  ;;  %v1814_v14 = vpack.c.bf16 %v4522_v46, %v4522_v46 }
 0x42a   : > { %3292 = vmatpush3.bf16.xpose.msra.mxu1 %v1609_v48  ;;  %v1610_v60 = vpack.c.bf16 %v1557_v57, %v1557_v57  ;;  %v4537_v61 = vadd.f32 %v1560_v59, %v1220_v53  ;;  %v1562_v62 = vpop.f32.mrb[3].mxu1  ;;  %v1815_v12 = vpack.c.bf16 %v4524_v49, %v4524_v49 }
 0x42b   : > { %3297 = vmatprep.subr.bf16.mxu1 %v3973_v34  ;;  %v4540_v63 = vadd.f32 %v1562_v62, %v4531_v56  ;;  %v1712_v53 = vpack.c.bf16 %v1559_v36, %v1559_v36 }
 0x42c   : > { %v1670_v0 = vsel %vm1668_vm2, %v1610_v60, 0  ;;  %v1816_v13 = vpack.c.bf16 %v4537_v61, %v4537_v61 }
 0x42e   : > { %v1874_v15 = vsel %vm1668_vm2, %v1816_v13, 0 }
 0x431   : > { %3294 = vmatmul.mubr.bf16.vlgmr.msra.gmra.mrb[4].mxu1 %v1608_v54 }
 0x432   : > { %3299 = vmatprep.mubr.msk.bf16.mxu1 %vm3974_vm1, %v3973_v34  ;;  %3298 = vmatpush3.bf16.msra.mxu1 %v1670_v0 }
 0x433   : > { %3303 = vmatprep.subr.bf16.mxu1 %v3973_v34 }
 0x445   : > { %v1599_v29 = vpop.f32.mrb[4].mxu0 }
 0x446   : > { %v1601_v37 = vpop.f32.mrb[5].mxu0  ;;  %v1600_v45 = vadd.f32 %v1599_v29, %v1228_v33 }
 0x447   : > { %v1603_v40 = vpop.f32.mrb[6].mxu0  ;;  %v1602_v52 = vadd.f32 %v1601_v37, %v1232_v39 }
 0x448   : > { %v4567_v41 = vadd.f32 %v1603_v40, %v1228_v33  ;;  %v1605_v42 = vpop.f32.mrb[7].mxu0  ;;  %v1713_v50 = vpack.c.bf16 %v1600_v45, %v1600_v45  ;;  %v1916_v40 = vpack.c.bf16 %v4540_v63, %v4540_v63 }
 0x449   : > { %v4569_v43 = vadd.f32 %v1605_v42, %v1232_v39  ;;  %v1714_v38 = vpack.c.bf16 %v1602_v52, %v1602_v52 }
 0x44a   : > { %v1917_v37 = vpack.c.bf16 %v4567_v41, %v4567_v41 }
 0x44b   : > { %v1772_v54 = vsel %vm1668_vm2, %v1714_v38, 0  ;;  %v1918_v39 = vpack.c.bf16 %v4569_v43, %v4569_v43 }
 0x44d   : > { %v1976_v42 = vsel %vm1668_vm2, %v1918_v39, 0 }
 0x504   : > { %v1645_v17 = vpop.f32.mrb[4].mxu1 }
 0x505   : > { %v1651_v18 = vmul.f32 0.25, %v1645_v17  ;;  %v3295_v19 = vpop.f32.mrb[5].mxu1 }
 0x506   : > { %v1648_v20 = vpop.f32.mrb[6].mxu1 }
 0x507   : > { %v3296_v21 = vpop.f32.mrb[7].mxu1  ;;  %v1653_v22 = vsel %vm1652_vm3, %v1651_v18, -inf }
 0x508   : > { %1654 = vmax.xlane.f32.xlu0 %v1653_v22 }
 0x595   : > { %v1655_v23 = vpop.xlane.xlu0 %1654 }
 0x596   : > { %v1656_v26 = vsub.f32 %v1651_v18, %v1655_v23 }
 0x598   : > { %v1657_v27 = vmul.f32 1.442695, %v1656_v26 }
 0x59a   : > { %3656 = vpow2.f32 %v1657_v27 }
 0x5a4   : > { %v3657_v28 = vpop.eup %3656 }
 0x5a5   : > { %v1659_v30 = vsel %vm1652_vm3, %v3657_v28, 0.0 }
 0x5a6   : > { %1660 = vadd.xlane.f32.xlu0 %v1659_v30 }
 0x633   : > { %v1661_v44 = vpop.xlane.xlu0 %1660 }
 0x634   : > { %3658 = vrcp.f32 %v1661_v44 }
 0x63e   : > { %v3659_v47 = vpop.eup %3658 }
 0x63f   : > { %v1663_v48 = vmul.f32 %v3659_v47, %v3657_v28 }
 0x641   : > { %v1664_v51 = vpack.c.bf16 %v1663_v48, %v1663_v48 }
 0x643   : > { %3300 = vmatmul.mubr.msk.bf16.vlgmr.msra.gmra.mrb[8].mxu1 %vm1652_vm3, %v1664_v51 }
 0x644   : > { %3304 = vmatpush3.bf16.xpose.msra.mxu1 %v1713_v50  ;;  %3305 = vmatprep.mubr.msk.bf16.mxu1 %vm3974_vm1, %v3973_v34 }
 0x645   : > { %3309 = vmatprep.subr.bf16.mxu1 %v3973_v34 }
 0x64b   : > { %3306 = vmatmul.mubr.bf16.vlgmr.msra.gmra.mrb[12].mxu1 %v1712_v53 }
 0x64c   : > { %3310 = vmatpush3.bf16.msra.mxu1 %v1772_v54  ;;  %3311 = vmatprep.mubr.msk.bf16.mxu1 %vm3974_vm1, %v3973_v34 }
 0x64d   : > { %3315 = vmatprep.subr.bf16.mxu1 %v3973_v34 }
 0x716   : > { %v4581_v55 = vpop.f32.mrb[8].mxu1 }
 0x717   : > { %v3301_v57 = vpop.f32.mrb[9].mxu1 }
 0x718   : > { %v1709_v59 = vpop.f32.mrb[10].mxu1 }
 0x719   : > { %v3302_v60 = vpop.f32.mrb[11].mxu1 }
 0x71a   : > { %v3624_v60 = vld [vmem:[%s4392_s29 + $0x40] sm:$0xff]  }
 0x71b   : > { %3198 = vmatprep.subr.bf16.mxu0 %v3624_v60 }
 0x71e   : > { %v1749_v62 = vpop.f32.mrb[12].mxu1 }
 0x71f   : > { %v1755_v56 = vmul.f32 0.25, %v1749_v62  ;;  %v3307_v58 = vpop.f32.mrb[13].mxu1  ;;  %v3625_v62 = vld [vmem:[%s4392_s29] sm:$0xff]  }
 0x720   : > { %v1752_v0 = vpop.f32.mrb[14].mxu1  ;;  %3199 = vmatpush3.bf16.msra.mxu0 %v3625_v62  ;;  %v3627_v58 = vld [vmem:[%s4392_s29 + $0x8] sm:$0xff]  }
 0x721   : > { %v3308_v1 = vpop.f32.mrb[15].mxu1  ;;  %v1756_v2 = vsel %vm1652_vm3, %v1755_v56, -inf  ;;  %v3628_v0 = vld [vmem:[%s4392_s29 + $0x50] sm:$0xff]  }
 0x722   : > { %1757 = vmax.xlane.f32.xlu1 %v1756_v2  ;;  %v3629_v1 = vld [vmem:[%s4392_s29 + $0x10] sm:$0xff]   ;;  %v3630_v2 = vld [vmem:[%s4392_s29 + $0x58] sm:$0xff]  }
 0x7af   : > { %v1758_v3 = vpop.xlane.xlu1 %1757 }
 0x7b0   : > { %v1759_v4 = vsub.f32 %v1755_v56, %v1758_v3  ;;  %v3626_v56 = vld [vmem:[%s4392_s29 + $0x48] sm:$0xff]   ;;  %v3631_v3 = vld [vmem:[%s4392_s29 + $0x18] sm:$0xff]  }
 0x7b1   : > { %3200 = vmatprep.subr.bf16.mxu0 %v3626_v56 }
 0x7b2   : > { %v1760_v5 = vmul.f32 1.442695, %v1759_v4  ;;  %3201 = vmatpush3.bf16.msra.mxu0 %v3627_v58  ;;  %v3632_v4 = vld [vmem:[%s4392_s29 + $0x60] sm:$0xff]  }
 0x7b3   : > { %3202 = vmatprep.subr.bf16.mxu0 %v3628_v0  ;;  %v3117_v0 = vld [vmem:[%s988_s17] ss:$0 sm:$0xff] }
 0x7b4   : > { %3660 = vpow2.f32 %v1760_v5  ;;  %v3633_v5 = vld [vmem:[%s4392_s29 + $0x20] sm:$0xff]  }
 0x7b6   : > { %3203 = vmatpush3.bf16.msra.mxu0 %v3629_v1 }
 0x7b7   : > { %3204 = vmatprep.subr.bf16.mxu0 %v3630_v2 }
 0x7ba   : > { %3205 = vmatpush3.bf16.msra.mxu0 %v3631_v3 }
 0x7bb   : > { %3206 = vmatprep.subr.bf16.mxu0 %v3632_v4 }
 0x7be   : > { %v3661_v6 = vpop.eup %3660  ;;  %3207 = vmatpush3.bf16.msra.mxu0 %v3633_v5  ;;  %v3648_v5 = vld [vmem:[%s4400_s13] sm:$0xff]  }
 0x7bf   : > { %v1762_v7 = vsel %vm1652_vm3, %v3661_v6, 0.0 }
 0x7c0   : > { %1763 = vadd.xlane.f32.xlu1 %v1762_v7  ;;  %v3635_v7 = vld [vmem:[%s4392_s29 + $0x28] sm:$0xff]  }
 0x84d   : > { %v1764_v8 = vpop.xlane.xlu1 %1763 }
 0x84e   : > { %3662 = vrcp.f32 %v1764_v8  ;;  %v3636_v8 = vld [vmem:[%s4392_s29 + $0x70] sm:$0xff]  }
 0x858   : > { %v3663_v9 = vpop.eup %3662 }
 0x859   : > { %v1766_v10 = vmul.f32 %v3663_v9, %v3661_v6  ;;  %v3634_v6 = vld [vmem:[%s4392_s29 + $0x68] sm:$0xff]   ;;  %v3637_v9 = vld [vmem:[%s4392_s29 + $0x30] sm:$0xff]  }
 0x85a   : > { %3208 = vmatprep.subr.bf16.mxu0 %v3634_v6  ;;  %v3649_v6 = vld [vmem:[%s4400_s13 + $0x8] sm:$0xff]  }
 0x85b   : > { %v1767_v11 = vpack.c.bf16 %v1766_v10, %v1766_v10  ;;  %3209 = vmatpush3.bf16.msra.mxu0 %v3635_v7  ;;  %v3650_v7 = vld [vmem:[%s4400_s13 + $0x10] sm:$0xff]  }
 0x85c   : > { %3210 = vmatprep.subr.bf16.mxu0 %v3636_v8  ;;  %v3651_v8 = vld [vmem:[%s4400_s13 + $0x18] sm:$0xff]  }
 0x85d   : > { %3312 = vmatmul.mubr.msk.bf16.vlgmr.msra.gmra.mrb[16].mxu1 %vm1652_vm3, %v1767_v11 }
 0x85e   : > { %3316 = vmatpush3.bf16.xpose.msra.mxu1 %v1815_v12  ;;  %3317 = vmatprep.mubr.msk.bf16.mxu1 %vm3974_vm1, %v3973_v34 }
 0x85f   : > { %3321 = vmatprep.subr.bf16.mxu1 %v3973_v34  ;;  %3211 = vmatpush3.bf16.msra.mxu0 %v3637_v9  ;;  %v3652_v9 = vld [vmem:[%s4400_s13 + $0x20] sm:$0xff]  }
 0x865   : > { %3318 = vmatmul.mubr.bf16.vlgmr.msra.gmra.mrb[20].mxu1 %v1814_v14  ;;  %v3638_v14 = vld [vmem:[%s4392_s29 + $0x78] sm:$0xff]  }
 0x866   : > { %3322 = vmatpush3.bf16.msra.mxu1 %v1874_v15  ;;  %3323 = vmatprep.mubr.msk.bf16.mxu1 %vm3974_vm1, %v3973_v34  ;;  %v3639_v15 = vld [vmem:[%s4392_s29 + $0x38] sm:$0xff]  }
 0x867   : > { %3327 = vmatprep.subr.bf16.mxu1 %v3973_v34  ;;  %3212 = vmatprep.subr.bf16.mxu0 %v3638_v14 }
 0x868   : > { %3213 = vmatpush3.bf16.msra.mxu0 %v3639_v15 }
 0x869   : > { %3359 = vmatprep.subr.bf16.mxu0 %v3973_v34 }
 0x930   : > { %v4599_v49 = vpop.f32.mrb[16].mxu1 }
 0x931   : > { %v3313_v16 = vpop.f32.mrb[17].mxu1 }
 0x932   : > { %v1811_v17 = vpop.f32.mrb[18].mxu1 }
 0x933   : > { %v3314_v18 = vpop.f32.mrb[19].mxu1 }
 0x938   : > { %v1851_v19 = vpop.f32.mrb[20].mxu1 }
 0x939   : > { %v1857_v20 = vmul.f32 0.25, %v1851_v19  ;;  %v3319_v61 = vpop.f32.mrb[21].mxu1 }
 0x93a   : > { %v1854_v21 = vpop.f32.mrb[22].mxu1 }
 0x93b   : > { %v3320_v22 = vpop.f32.mrb[23].mxu1  ;;  %v1858_v46 = vsel %vm1652_vm3, %v1857_v20, -inf  ;;  %v3099_v21 = vld [vmem:[%s4923_s15] ss:$0 sm:$0xff] }
 0x93c   : > { %1859 = vmax.xlane.f32.xlu0 %v1858_v46 }
 0x9c9   : > { %v1860_v23 = vpop.xlane.xlu0 %1859 }
 0x9ca   : > { %v1861_v26 = vsub.f32 %v1857_v20, %v1860_v23 }
 0x9cc   : > { %v1862_v27 = vmul.f32 1.442695, %v1861_v26 }
 0x9ce   : > { %3664 = vpow2.f32 %v1862_v27 }
 0x9d8   : > { %v3665_v28 = vpop.eup %3664 }
 0x9d9   : > { %v1864_v30 = vsel %vm1652_vm3, %v3665_v28, 0.0 }
 0x9da   : > { %1865 = vadd.xlane.f32.xlu1 %v1864_v30 }
 0xa67   : > { %v1866_v31 = vpop.xlane.xlu1 %1865 }
 0xa68   : > { %3666 = vrcp.f32 %v1866_v31  ;;  %v3640_v31 = vld [vmem:[%s4394_s11] sm:$0xff]  }
 0xa72   : > { %v3667_v29 = vpop.eup %3666 }
 0xa73   : > { %v1868_v32 = vmul.f32 %v3667_v29, %v3665_v28  ;;  %v3641_v29 = vld [vmem:[%s4394_s11 + $0x8] sm:$0xff]  }
 0xa75   : > { %v1869_v33 = vpack.c.bf16 %v1868_v32, %v1868_v32  ;;  %v4661_v32 = vand.u32 127, %v1209_v35 }
 0xa77   : > { %3324 = vmatmul.mubr.msk.bf16.vlgmr.msra.gmra.mrb[24].mxu1 %vm1652_vm3, %v1869_v33  ;;  %vm2208_vm4 = vcmp.lt.s32.totalorder %v4661_v32, 32 }
 0xa78   : > { %3328 = vmatpush3.bf16.xpose.msra.mxu1 %v1917_v37  ;;  %3329 = vmatprep.mubr.msk.bf16.mxu1 %vm3974_vm1, %v3973_v34 }
 0xa79   : > { %3333 = vmatprep.subr.bf16.mxu1 %v3973_v34 }
 0xa7f   : > { %3330 = vmatmul.mubr.bf16.vlgmr.msra.gmra.mrb[28].mxu1 %v1916_v40 }
 0xa80   : > { %3334 = vmatpush3.bf16.msra.mxu1 %v1976_v42  ;;  %3335 = vmatprep.mubr.msk.bf16.mxu1 %vm3974_vm1, %v3973_v34 }
 0xa81   : > { %3339 = vmatprep.subr.bf16.mxu1 %v3973_v34 }
 0xb4a   : > { %v4617_v41 = vpop.f32.mrb[24].mxu1 }
 0xb4b   : > { %v2018_v44 = vpack.c.bf16 %v4617_v41, %v4581_v55  ;;  %v3325_v45 = vpop.f32.mrb[25].mxu1 }
 0xb4c   : > { %v1913_v47 = vpop.f32.mrb[26].mxu1  ;;  %v3642_v45 = vld [vmem:[%s4394_s11 + $0x10] sm:$0xff]  }
 0xb4d   : > { %v3326_v43 = vpop.f32.mrb[27].mxu1  ;;  %v3643_v47 = vld [vmem:[%s4394_s11 + $0x18] sm:$0xff]  }
 0xb4e   : > { %v3644_v43 = vld [vmem:[%s4394_s11 + $0x20] sm:$0xff]  }
 0xb52   : > { %v1953_v63 = vpop.f32.mrb[28].mxu1 }
 0xb53   : > { %v1959_v48 = vmul.f32 0.25, %v1953_v63  ;;  %v3331_v50 = vpop.f32.mrb[29].mxu1  ;;  %v3645_v63 = vld [vmem:[%s4394_s11 + $0x28] sm:$0xff]  }
 0xb54   : > { %v1956_v51 = vpop.f32.mrb[30].mxu1  ;;  %v3647_v50 = vld [vmem:[%s4394_s11 + $0x38] sm:$0xff]  }
 0xb55   : > { %v3332_v52 = vpop.f32.mrb[31].mxu1  ;;  %v1960_v36 = vsel %vm1652_vm3, %v1959_v48, -inf }
 0xb56   : > { %1961 = vmax.xlane.f32.xlu0 %v1960_v36 }
 0xbe3   : > { %v1962_v38 = vpop.xlane.xlu0 %1961 }
 0xbe4   : > { %v1963_v53 = vsub.f32 %v1959_v48, %v1962_v38  ;;  %v3646_v48 = vld [vmem:[%s4394_s11 + $0x30] sm:$0xff]  }
 0xbe6   : > { %v1964_v54 = vmul.f32 1.442695, %v1963_v53 }
 0xbe8   : > { %3668 = vpow2.f32 %v1964_v54 }
 0xbf2   : > { %v3669_v57 = vpop.eup %3668 }
 0xbf3   : > { %v1966_v59 = vsel %vm1652_vm3, %v3669_v57, 0.0 }
 0xbf4   : > { %1967 = vadd.xlane.f32.xlu1 %v1966_v59  ;;  %v3116_v59 = vld [vmem:[%s4924_s22] ss:$0 sm:$0xff] }
 0xc81   : > { %v1968_v10 = vpop.xlane.xlu1 %1967 }
 0xc82   : > { %3670 = vrcp.f32 %v1968_v10  ;;  %v3653_v10 = vld [vmem:[%s4400_s13 + $0x28] sm:$0xff]  }
 0xc8c   : > { %v3671_v11 = vpop.eup %3670 }
 0xc8d   : > { %v1970_v12 = vmul.f32 %v3671_v11, %v3669_v57  ;;  %v3654_v11 = vld [vmem:[%s4400_s13 + $0x30] sm:$0xff]  }
 0xc8f   : > { %v1971_v13 = vpack.c.bf16 %v1970_v12, %v1970_v12  ;;  %v3655_v12 = vld [vmem:[%s4400_s13 + $0x38] sm:$0xff]  }
 0xc91   : > { %3336 = vmatmul.mubr.msk.bf16.vlgmr.msra.gmra.mrb[32].mxu1 %vm1652_vm3, %v1971_v13  ;;  %v3118_v13 = vld [vmem:[%s991_s0] ss:$0 sm:$0xff] }
 0xc92   : > { %3355 = vmatprep.mubr.msk.bf16.mxu1 %vm3974_vm1, %v3973_v34  ;;  %3340 = vmatpush3.bf16.msra.mxu1 %v3640_v31 }
 0xc93   : > { %3341 = vmatprep.subr.bf16.mxu1 %v3973_v34 }
 0xc96   : > { %3342 = vmatpush3.bf16.msra.mxu1 %v3641_v29 }
 0xc97   : > { %3343 = vmatprep.subr.bf16.mxu1 %v3973_v34 }
 0xc9a   : > { %3344 = vmatpush3.bf16.msra.mxu1 %v3642_v45 }
 0xc9b   : > { %3345 = vmatprep.subr.bf16.mxu1 %v3973_v34 }
 0xc9e   : > { %3346 = vmatpush3.bf16.msra.mxu1 %v3643_v47 }
 0xc9f   : > { %3347 = vmatprep.subr.bf16.mxu1 %v3973_v34 }
 0xca2   : > { %3348 = vmatpush3.bf16.msra.mxu1 %v3644_v43 }
 0xca3   : > { %3349 = vmatprep.subr.bf16.mxu1 %v3973_v34 }
 0xca6   : > { %3350 = vmatpush3.bf16.msra.mxu1 %v3645_v63 }
 0xca7   : > { %3351 = vmatprep.subr.bf16.mxu1 %v3973_v34 }
 0xcaa   : > { %3352 = vmatpush3.bf16.msra.mxu1 %v3646_v48 }
 0xcab   : > { %3353 = vmatprep.subr.bf16.mxu1 %v3973_v34 }
 0xcae   : > { %3354 = vmatpush3.bf16.msra.mxu1 %v3647_v50 }
 0xd64   : > { %v2012_v16 = vpop.f32.mrb[32].mxu1 }
 0xd65   : > { %v2019_v17 = vpack.c.bf16 %v2012_v16, %v4599_v49  ;;  %v3337_v18 = vpop.f32.mrb[33].mxu1 }
 0xd66   : > { %v2015_v19 = vpop.f32.mrb[34].mxu1 }
 0xd67   : > { %v3338_v20 = vpop.f32.mrb[35].mxu1  ;;  %2187 = vmatprep.mubr.bf16.mxu0 %v2019_v17 }
 0xd68   : > { %2188 = vmatmul.mubr.bf16.vlgmr.msra.gmra.mrb[8].mxu0 %v2018_v44 }
 0xd69   : > { %3375 = vmatprep.mubr.msk.bf16.mxu0 %vm3974_vm1, %v3973_v34  ;;  %3360 = vmatpush3.bf16.msra.mxu0 %v3648_v5 }
 0xd6a   : > { %3361 = vmatprep.subr.bf16.mxu0 %v3973_v34 }
 0xd6d   : > { %3362 = vmatpush3.bf16.msra.mxu0 %v3649_v6 }
 0xd6e   : > { %3363 = vmatprep.subr.bf16.mxu0 %v3973_v34 }
 0xd71   : > { %3364 = vmatpush3.bf16.msra.mxu0 %v3650_v7 }
 0xd72   : > { %3365 = vmatprep.subr.bf16.mxu0 %v3973_v34 }
 0xd75   : > { %3366 = vmatpush3.bf16.msra.mxu0 %v3651_v8 }
 0xd76   : > { %3367 = vmatprep.subr.bf16.mxu0 %v3973_v34 }
 0xd79   : > { %3368 = vmatpush3.bf16.msra.mxu0 %v3652_v9 }
 0xd7a   : > { %3369 = vmatprep.subr.bf16.mxu0 %v3973_v34 }
 0xd7d   : > { %3370 = vmatpush3.bf16.msra.mxu0 %v3653_v10 }
 0xd7e   : > { %3371 = vmatprep.subr.bf16.mxu0 %v3973_v34 }
 0xd81   : > { %3372 = vmatpush3.bf16.msra.mxu0 %v3654_v11  ;;  %v3975_v11 = vmov (!%p3138_p5), 0.0  }
 0xd82   : > { %3373 = vmatprep.subr.bf16.mxu0 %v3973_v34  ;;  %3399 = vmatprep.subr.bf16.mxu1 (!%p3138_p5), %v3975_v11 }
 0xd85   : > { %3374 = vmatpush3.bf16.msra.mxu0 %v3655_v12 }
 0xd86   : > { %3379 = vmatprep.subr.bf16.mxu0 (!%p3138_p5), %v3975_v11 }
 0xe3b   : > { %v3214_v61 = vpop.f32.mrb[8].mxu0 }
 0xe3c   : > { %v3215_v49 = vpop.f32.mrb[9].mxu0 }
 0xe3d   : > { %v3216_v22 = vadd.f32 %v3215_v49, %v3214_v61  ;;  %v3217_v46 = vpop.f32.mrb[10].mxu0 }
 0xe3e   : > { %v3218_v23 = vpop.f32.mrb[11].mxu0 }
 0xe3f   : > { %v2190_v26 = vadd.f32 %v3216_v22, %v3099_v21  ;;  %v3219_v27 = vadd.f32 %v3218_v23, %v3217_v46 }
 0xe41   : > { %v2193_v28 = vadd.f32 %v3219_v27, %v3099_v21  ;;  %v2196_v55 = vadd.f32 %v2190_v26, %v4491_v24 }
 0xe43   : > { %2200 = vadd.xlane.f32.xlu0 %v2196_v55  ;;  %v2197_v30 = vadd.f32 %v2193_v28, %v4493_v25 }
 0xe45   : > { %2202 = vadd.xlane.f32.xlu1 %v2197_v30 }
 0xed0   : > { %v2201_v33 = vpop.xlane.xlu0 %2200 }
 0xed1   : > { %v2204_v37 = vmul.f32 0.03125, %v2201_v33 }
 0xed2   : > { %v2203_v24 = vpop.xlane.xlu1 %2202 }
 0xed3   : > { %v2209_v25 = vsub.f32 %v2196_v55, %v2204_v37  ;;  %v2205_v39 = vmul.f32 0.03125, %v2203_v24 }
 0xed5   : > { %v2210_v40 = vsub.f32 %v2197_v30, %v2205_v39  ;;  %v2211_v42 = vsel %vm2208_vm4, %v2209_v25, 0.0  ;;  %v3127_v39 = vld [vmem:[%s994_s28] ss:$0 sm:$0xff] }
 0xed6   : > { %v2213_v41 = vmul.f32 %v2211_v42, %v2211_v42 }
 0xed7   : > { %v2212_v44 = vsel %vm2208_vm4, %v2210_v40, 0.0 }
 0xed8   : > { %2215 = vadd.xlane.f32.xlu0 %v2213_v41  ;;  %v2214_v35 = vmul.f32 %v2212_v44, %v2212_v44 }
 0xeda   : > { %2217 = vadd.xlane.f32.xlu1 %v2214_v35 }
 0xf65   : > { %v2216_v51 = vpop.xlane.xlu0 %2215 }
 0xf66   : > { %v2219_v52 = vmul.f32 0.03125, %v2216_v51 }
 0xf67   : > { %v2218_v36 = vpop.xlane.xlu1 %2217 }
 0xf68   : > { %v2221_v38 = vadd.f32 1e-05, %v2219_v52  ;;  %v2220_v53 = vmul.f32 0.03125, %v2218_v36 }
 0xf6a   : > { %3672 = vrsqrt.f32 %v2221_v38  ;;  %v2222_v54 = vadd.f32 1e-05, %v2220_v53 }
 0xf6c   : > { %3674 = vrsqrt.f32 %v2222_v54 }
 0xf74   : > { %v3673_v57 = vpop.eup %3672 }
 0xf75   : > { %v2225_v60 = vmul.f32 %v3673_v57, %v2211_v42 }
 0xf76   : > { %v3675_v62 = vpop.eup %3674 }
 0xf77   : > { %v2226_v56 = vmul.f32 %v3675_v62, %v2212_v44  ;;  %v2233_v58 = vmul.f32 %v3116_v59, %v2225_v60 }
 0xf79   : > { %v2234_v1 = vmul.f32 %v3116_v59, %v2226_v56  ;;  %v4689_v2 = vadd.f32 %v3117_v0, %v2233_v58 }
 0xf7b   : > { %v4691_v3 = vadd.f32 %v3117_v0, %v2234_v1 }
 0xf7d   : > { %v2243_v4 = vpack.c.bf16 %v4691_v3, %v4689_v2 }
 0xf7f   : > { %3356 = vmatmul.mubr.bf16.vlgmr.msra.gmra.mrb[36].mxu1 %v2243_v4  ;;  %v3137_v4 = vld [vmem:[%s1000_s1] ss:$0 sm:$0xff] }
 0xf80   : > { %3415 = vmatprep.mubr.msk.bf16.mxu1 (!%p3138_p5), %vm3976_vm5, %v3975_v11 }
0x1052   : > { %v2349_v14 = vpop.f32.mrb[36].mxu1 }
0x1053   : > { %v2350_v15 = vadd.f32 %v3118_v13, %v2349_v14  ;;  %v3357_v16 = vpop.f32.mrb[37].mxu1  ;;  %v3692_v14 = vld [vmem:[#allocation12] sm:$0xff] (!%p3138_p5)  }
0x1054   : > { %v2352_v17 = vpop.f32.mrb[38].mxu1  ;;  %3400 = vmatpush3.bf16.msra.mxu1 (!%p3138_p5), %v3692_v14  ;;  %v3693_v16 = vld [vmem:[#allocation12 + $0x8] sm:$0xff] (!%p3138_p5)  }
0x1055   : > { %v2356_v18 = vmul.f32 %v2350_v15, %v2350_v15  ;;  %v2353_v19 = vadd.f32 %v3118_v13, %v2352_v17  ;;  %v3358_v20 = vpop.f32.mrb[39].mxu1  ;;  %3401 = vmatprep.subr.bf16.mxu1 (!%p3138_p5), %v3975_v11 }
0x1057   : > { %v2358_v61 = vmul.f32 %v2356_v18, %v2350_v15  ;;  %v2357_v21 = vmul.f32 %v2353_v19, %v2353_v19  ;;  %v3694_v18 = vld [vmem:[#allocation12 + $0x10] sm:$0xff] (!%p3138_p5)  }
0x1058   : > { %3402 = vmatpush3.bf16.msra.mxu1 (!%p3138_p5), %v3693_v16 }
0x1059   : > { %v2360_v49 = vmul.f32 0.044715, %v2358_v61  ;;  %v2359_v22 = vmul.f32 %v2357_v21, %v2353_v19  ;;  %3403 = vmatprep.subr.bf16.mxu1 (!%p3138_p5), %v3975_v11  ;;  %v3695_v61 = vld [vmem:[#allocation12 + $0x18] sm:$0xff] (!%p3138_p5)  }
0x105b   : > { %v2362_v46 = vadd.f32 %v2360_v49, %v2350_v15  ;;  %v2361_v34 = vmul.f32 0.044715, %v2359_v22 }
0x105c   : > { %3404 = vmatpush3.bf16.msra.mxu1 (!%p3138_p5), %v3694_v18 }
0x105d   : > { %v2364_v23 = vmul.f32 0.7978846, %v2362_v46  ;;  %v2363_v26 = vadd.f32 %v2361_v34, %v2353_v19  ;;  %3405 = vmatprep.subr.bf16.mxu1 (!%p3138_p5), %v3975_v11 }
0x105f   : > { %3676 = vtanh.f32 %v2364_v23  ;;  %v2365_v27 = vmul.f32 0.7978846, %v2363_v26  ;;  %v3696_v26 = vld [vmem:[#allocation12 + $0x20] sm:$0xff] (!%p3138_p5)  }
0x1060   : > { %3406 = vmatpush3.bf16.msra.mxu1 (!%p3138_p5), %v3695_v61 }
0x1061   : > { %3678 = vtanh.f32 %v2365_v27  ;;  %3407 = vmatprep.subr.bf16.mxu1 (!%p3138_p5), %v3975_v11  ;;  %v3697_v27 = vld [vmem:[#allocation12 + $0x28] sm:$0xff] (!%p3138_p5)  }
0x1064   : > { %3408 = vmatpush3.bf16.msra.mxu1 (!%p3138_p5), %v3696_v26 }
0x1065   : > { %3409 = vmatprep.subr.bf16.mxu1 (!%p3138_p5), %v3975_v11 }
0x1068   : > { %3410 = vmatpush3.bf16.msra.mxu1 (!%p3138_p5), %v3697_v27 }
0x1069   : > { %v3677_v28 = vpop.eup %3676  ;;  %3411 = vmatprep.subr.bf16.mxu1 (!%p3138_p5), %v3975_v11 }
0x106a   : > { %v2368_v55 = vadd.f32 1.0, %v3677_v28  ;;  %v3698_v28 = vld [vmem:[#allocation12 + $0x30] sm:$0xff] (!%p3138_p5)  }
0x106b   : > { %v3679_v30 = vpop.eup %3678 }
0x106c   : > { %v2370_v31 = vmul.f32 0.5, %v2368_v55  ;;  %v2369_v29 = vadd.f32 1.0, %v3679_v30  ;;  %3412 = vmatpush3.bf16.msra.mxu1 (!%p3138_p5), %v3698_v28  ;;  %v3699_v55 = vld [vmem:[#allocation12 + $0x38] sm:$0xff] (!%p3138_p5)   ;;  %v3139_v30 = vld [vmem:[%s4931_s2] ss:$0 sm:$0xff] (!%p3138_p5) }
0x106d   : > { %3413 = vmatprep.subr.bf16.mxu1 (!%p3138_p5), %v3975_v11 }
0x106e   : > { %v2371_v33 = vmul.f32 0.5, %v2369_v29  ;;  %v2372_v37 = vmul.f32 %v2370_v31, %v2350_v15 }
0x1070   : > { %v2373_v24 = vmul.f32 %v2371_v33, %v2353_v19  ;;  %3414 = vmatpush3.bf16.msra.mxu1 (!%p3138_p5), %v3699_v55 }
0x1072   : > { %v2374_v25 = vpack.c.bf16 %v2373_v24, %v2372_v37 }
0x1074   : > { %3376 = vmatmul.mubr.bf16.vlgmr.msra.gmra.mrb[12].mxu0 %v2374_v25 }
0x1075   : > { %3395 = vmatprep.mubr.msk.bf16.mxu0 (!%p3138_p5), %vm3976_vm5, %v3975_v11 }
0x1147   : > { %v2480_v40 = vpop.f32.mrb[12].mxu0 }
0x1148   : > { %v2481_v42 = vadd.f32 %v3127_v39, %v2480_v40  ;;  %v3377_v41 = vpop.f32.mrb[13].mxu0  ;;  %v3148_v40 = vld [vmem:[%s4932_s5] ss:$0 sm:$0xff] (!%p3138_p5) }
0x1149   : > { %v2483_v44 = vpop.f32.mrb[14].mxu0 }
0x114a   : > { %v2484_v35 = vadd.f32 %v3127_v39, %v2483_v44  ;;  %v3378_v45 = vpop.f32.mrb[15].mxu0  ;;  %v2487_v47 = vadd.f32 %v2481_v42, %v4689_v2  ;;  %v3136_v2 = vld [vmem:[%s997_s6] ss:$0 sm:$0xff]  ;;  %s4930_s6 = sld [smem:[#allocation39_spill]] (!%p3138_p5) }
0x114c   : > { %2491 = vadd.xlane.f32.xlu0 %v2487_v47  ;;  %v2488_v43 = vadd.f32 %v2484_v35, %v4691_v3 }
0x114e   : > { %2493 = vadd.xlane.f32.xlu1 %v2488_v43 }
0x1150   : > { %v3684_v10 = vld [vmem:[%s4930_s6] sm:$0xff] (!%p3138_p5)   ;;  %v3685_v12 = vld [vmem:[%s4930_s6 + $0x8] sm:$0xff] (!%p3138_p5)   ;;  %v3686_v13 = vld [vmem:[%s4930_s6 + $0x10] sm:$0xff] (!%p3138_p5)  }
0x1151   : > { %3380 = vmatpush3.bf16.msra.mxu0 (!%p3138_p5), %v3684_v10  ;;  %v3687_v15 = vld [vmem:[%s4930_s6 + $0x18] sm:$0xff] (!%p3138_p5)   ;;  %v3688_v17 = vld [vmem:[%s4930_s6 + $0x20] sm:$0xff] (!%p3138_p5)   ;;  %v3689_v19 = vld [vmem:[%s4930_s6 + $0x28] sm:$0xff] (!%p3138_p5)  }
0x1152   : > { %3381 = vmatprep.subr.bf16.mxu0 (!%p3138_p5), %v3975_v11  ;;  %v3690_v21 = vld [vmem:[%s4930_s6 + $0x30] sm:$0xff] (!%p3138_p5)   ;;  %v3691_v46 = vld [vmem:[%s4930_s6 + $0x38] sm:$0xff] (!%p3138_p5)  }
0x1155   : > { %3382 = vmatpush3.bf16.msra.mxu0 (!%p3138_p5), %v3685_v12 }
0x1156   : > { %3383 = vmatprep.subr.bf16.mxu0 (!%p3138_p5), %v3975_v11 }
0x1159   : > { %3384 = vmatpush3.bf16.msra.mxu0 (!%p3138_p5), %v3686_v13 }
0x115a   : > { %3385 = vmatprep.subr.bf16.mxu0 (!%p3138_p5), %v3975_v11 }
0x115d   : > { %3386 = vmatpush3.bf16.msra.mxu0 (!%p3138_p5), %v3687_v15 }
0x115e   : > { %3387 = vmatprep.subr.bf16.mxu0 (!%p3138_p5), %v3975_v11 }
0x1161   : > { %3388 = vmatpush3.bf16.msra.mxu0 (!%p3138_p5), %v3688_v17 }
0x1162   : > { %3389 = vmatprep.subr.bf16.mxu0 (!%p3138_p5), %v3975_v11 }
0x1165   : > { %3390 = vmatpush3.bf16.msra.mxu0 (!%p3138_p5), %v3689_v19 }
0x1166   : > { %3391 = vmatprep.subr.bf16.mxu0 (!%p3138_p5), %v3975_v11 }
0x1169   : > { %3392 = vmatpush3.bf16.msra.mxu0 (!%p3138_p5), %v3690_v21 }
0x116a   : > { %3393 = vmatprep.subr.bf16.mxu0 (!%p3138_p5), %v3975_v11 }
0x116d   : > { %3394 = vmatpush3.bf16.msra.mxu0 (!%p3138_p5), %v3691_v46 }
0x11d9   : > { %v2492_v63 = vpop.xlane.xlu0 %2491 }
0x11da   : > { %v2495_v48 = vmul.f32 0.03125, %v2492_v63 }
0x11db   : > { %v2494_v50 = vpop.xlane.xlu1 %2493 }
0x11dc   : > { %v2497_v51 = vsub.f32 %v2487_v47, %v2495_v48  ;;  %v2496_v52 = vmul.f32 0.03125, %v2494_v50 }
0x11de   : > { %v2498_v36 = vsub.f32 %v2488_v43, %v2496_v52  ;;  %v2499_v38 = vsel %vm2208_vm4, %v2497_v51, 0.0 }
0x11df   : > { %v2501_v53 = vmul.f32 %v2499_v38, %v2499_v38 }
0x11e0   : > { %v2500_v54 = vsel %vm2208_vm4, %v2498_v36, 0.0 }
0x11e1   : > { %2503 = vadd.xlane.f32.xlu0 %v2501_v53  ;;  %v2502_v57 = vmul.f32 %v2500_v54, %v2500_v54  ;;  %v2783_v53 = vld [vmem:[%s4934_s3] sm:$0x3] (!%p3138_p5) }
0x11e3   : > { %2505 = vadd.xlane.f32.xlu1 %v2502_v57 }
0x126e   : > { %v2504_v59 = vpop.xlane.xlu0 %2503 }
0x126f   : > { %v2507_v60 = vmul.f32 0.03125, %v2504_v59 }
0x1270   : > { %v2506_v62 = vpop.xlane.xlu1 %2505 }
0x1271   : > { %v2509_v56 = vadd.f32 1e-05, %v2507_v60  ;;  %v2508_v58 = vmul.f32 0.03125, %v2506_v62 }
0x1273   : > { %3680 = vrsqrt.f32 %v2509_v56  ;;  %v2510_v0 = vadd.f32 1e-05, %v2508_v58 }
0x1275   : > { %3682 = vrsqrt.f32 %v2510_v0 }
0x127d   : > { %v3681_v1 = vpop.eup %3680 }
0x127e   : > { %v2513_v32 = vmul.f32 %v3681_v1, %v2499_v38 }
0x127f   : > { %v3683_v3 = vpop.eup %3682 }
0x1280   : > { %v2521_v5 = vmul.f32 %v3136_v2, %v2513_v32  ;;  %v2514_v6 = vmul.f32 %v3683_v3, %v2500_v54  ;;  %2536 = sbr.rel (%p3138_p5) target bundleno = 5675 (0x162b), region = 144 }
0x1282   : > { %v2529_v7 = vadd.f32 %v3137_v4, %v2521_v5  ;;  %v2522_v8 = vmul.f32 %v3136_v2, %v2514_v6 }
0x1284   : > { %2531 = vst [vmem:[#allocation2] sm:$0xff] %v2529_v7  ;;  %v2530_v9 = vadd.f32 %v3137_v4, %v2522_v8 }
0x1286   : > { %2532 = vst [vmem:[#allocation2 + $0x8] sm:$0xff] %v2530_v9 }
0x128b   : > { %v2537_v22 = vld [vmem:[#allocation2] sm:$0xff] }
0x128d   : > { %v2538_v20 = vld [vmem:[#allocation2 + $0x8] sm:$0xff] }
0x128e   : > { %v2540_v49 = vrot.slane %v2538_v20, 7 }
0x1290   : > { %v2543_v34 = vsel %vm2542_vm6, %v2537_v22, %v2540_v49 }
0x1291   : > { %v2544_v23 = vpack.c.bf16 %v2543_v34, %v2543_v34 }
0x1293   : > { %3396 = vmatmul.mubr.bf16.vlgmr.msra.gmra.mrb[0].mxu0 %v2544_v23 }
0x1366   : > { %v2650_v31 = vpop.f32.mrb[0].mxu0 }
0x1367   : > { %v2651_v29 = vadd.f32 %v3139_v30, %v2650_v31  ;;  %v3397_v33 = vpop.f32.mrb[1].mxu0 }
0x1368   : > { %v2653_v37 = vpop.f32.mrb[2].mxu0 }
0x1369   : > { %3700 = vtanh.f32 %v2651_v29  ;;  %v3398_v24 = vpop.f32.mrb[3].mxu0 }
0x1373   : > { %v3701_v25 = vpop.eup %3700 }
0x1374   : > { %v2657_v39 = vpack.c.bf16 %v3701_v25, %v3701_v25 }
0x1376   : > { %3416 = vmatmul.mubr.bf16.vlgmr.msra.gmra.mrb[0].mxu1 %v2657_v39 }
0x1449   : > { %v2763_v42 = vpop.f32.mrb[0].mxu1 }
0x144a   : > { %v2764_v41 = vadd.f32 %v3148_v40, %v2763_v42  ;;  %v3417_v44 = vpop.f32.mrb[1].mxu1 }
0x144b   : > { %v2766_v35 = vpop.f32.mrb[2].mxu1 }
0x144c   : > { %2769 = vst [vmem:[%s4933_s27] sm:$0x3] %v2764_v41  ;;  %v3418_v45 = vpop.f32.mrb[3].mxu1  ;;  %v2771_v47 = vsel %vm2770_vm7, %v2764_v41, -inf }
0x144d   : > { %2772 = vmax.xlane.f32.xlu0 %v2771_v47 }
0x14da   : > { %v2773_v43 = vpop.xlane.xlu0 %2772 }
0x14db   : > { %v2774_v63 = vsub.f32 %v2764_v41, %v2773_v43 }
0x14dd   : > { %v2775_v48 = vmul.f32 1.442695, %v2774_v63 }
0x14df   : > { %3702 = vpow2.f32 %v2775_v48 }
0x14e9   : > { %v3703_v50 = vpop.eup %3702 }
0x14ea   : > { %v2777_v51 = vsel %vm2770_vm7, %v3703_v50, 0.0 }
0x14eb   : > { %2778 = vadd.xlane.f32.xlu0 %v2777_v51 }
0x1578   : > { %v2779_v52 = vpop.xlane.xlu0 %2778 }
0x1579   : > { %3704 = vlog2.f32 %v2779_v52 }
0x1583   : > { %v3705_v36 = vpop.eup %3704 }
0x1584   : > { %v2781_v38 = vmul.f32 0.6931472, %v3705_v36 }
0x1586   : > { %v2782_v54 = vsub.f32 %v2774_v63, %v2781_v38 }
0x1588   : > { %v2784_v57 = vmul.f32 %v2783_v53, %v2782_v54 }
0x158a   : > { %v2785_v59 = vsel %vm2770_vm7, %v2784_v57, 0.0 }
0x158b   : > { %2786 = vadd.xlane.f32.xlu1 %v2785_v59 }
0x1618   : > { %v2787_v60 = vpop.xlane.xlu1 %2786 }
0x1619   : > { %v2788_v62 = vsub.f32 0.0, %v2787_v60 }
0x161b   : > { %v2789_v56 = vsel %vm2770_vm7, %v2788_v62, 0.0 }
0x161c   : > { %v2790_v58 = vrot.slane %v2789_v56, 4 }
0x161e   : > { %v2791_v0 = vadd.f32 %v2790_v58, %v2789_v56 }
0x1620   : > { %v2792_v1 = vrot.slane %v2791_v0, 2 }
0x1622   : > { %v2793_v2 = vadd.f32 %v2792_v1, %v2791_v0 }
0x1624   : > { %v2794_v32 = vrot.slane %v2793_v2, 1 }
0x1626   : > { %v2795_v3 = vadd.f32 %v2794_v32, %v2793_v2 }
0x1628   : > { %v2796_v4 = vmul.f32 0.5, %v2795_v3 }
0x162a   : > { %2798 = vst.msk [vmem:[#allocation14] sm:$0x1] %vm2797_vm8, %v2796_v4 }
0x162b PF: > { %p3500_p7 = scmp.eq.s32.totalorder %s4239_s24, 1  ;;  %s3977_s1 = smov [#allocation14]  }
0x162c   : > { %s2809_s16 = sshll.u32 %s3977_s1, 4  ;;  %s2810_s16 = int_to_ptr.vmem [resolvable:$true] %s2809_s16 }
0x162d   : > { %s3882_s29 = scalar_lea.vmem %s2810_s16, 16  ;;  %s3888_s15 = scalar_lea.vmem %s2810_s16, 32 }
0x162e   : > { %p3883_p2 = scmp.ne.s32.totalorder %s2810_s16, %s3882_s29  ;;  %p3889_p1 = scmp.lt.s32.totalorder %s2810_s16, %s2810_s16 }
0x162f   : > { %p3890_p8 = scmp.lt.s32.totalorder %s3888_s15, %s3882_s29 }
0x1630   : > { %p3884_p6 = pnand %p3883_p2, %p3500_p7 }
0x1631   : > { %p3891_p10 = por %p3890_p8, %p3889_p1 }
0x1632   : > { %p3885_p12 = pneg %p3884_p6 }
0x1634   : > { %p3892_p13 = pnand %p3891_p10, %p3885_p12 }
0x1636   : > { %3895 = shalt.err (!%p3892_p13)
}
0x1637   : > { %s4935_s22 = sld [smem:[#allocation45_spill]] }
0x163d   : > { %s3896_s11 = scalar_lea.hbm %s4935_s22, 16 }
0x163e   : > { %p3897_p3 = scmp.ne.s32.totalorder %s4935_s22, %s3896_s11  ;;  %p3902_p11 = scmp.lt.u32.totalorder %s3896_s11, %s4935_s22 }
0x1640   : > { %p3898_p9 = pnand %p3897_p3, %p3500_p7 }
0x1642   : > { %p3899_p4 = pneg %p3898_p9 }
0x1644   : > { %p3904_p0 = pnand %p3902_p11, %p3899_p4 }
0x1646   : > { %3907 = shalt.err (!%p3904_p0)
}
0x1647   : > { %3472 = dma.vmem_to_hbm [thread:$0]  (%p3500_p7), %s2810_s16, 16, %s4935_s22, [#allocation5]  }
0x1648   : > { %3941 = dma.done.wait (%p3500_p7), [#allocation5], 16  }
0x1649   : > { %3943 = vsyncadd (%p3500_p7), [#allocation5], 4294967280 }
0x164a PF: > { %s4936_s28 = sld [smem:[#allocation21_spill]]  ;;  %s4937_s13 = sld [smem:[#allocation20_spill]] }
0x164b   : > { %s4938_s27 = sld [smem:[#allocation22_spill]]  ;;  %s4939_s5 = smov %s3950_s26 }
0x1650   : > { %p41_p5 = scmp.ge.s32.totalorder %s4936_s28, 4   ;;  %s4940_s26 = smov %s4937_s13 }
0x1652   :  { %43 = sbr.rel (!%p41_p5) target bundleno = 32 (0x20), region = 233 }
0x1659   :  { %2825 = vsyncpa [#allocation4], 1 }
0x165a   :  { %2827 = vsyncpa [#allocation4 + $0x1], 1 }
0x165b   :  { %2828 = vsyncpa [#allocation7], 1 }
0x165c   :  { %2830 = vsyncpa [#allocation7 + $0x1], 1 }
0x165d   :  { %2831 = vsyncpa [#allocation10], 1 }
0x165e   :  { %2833 = vsyncpa [#allocation10 + $0x1], 1 }
0x165f   :  { %2834 = vsyncpa [#allocation13], 1 }
0x1660   :  { %2835 = vsyncpa [#allocation5], 1 }
0x1661   :  { %2837 = vsyncpa [#allocation5 + $0x1], 1 }

</bundles_post_ra>
